<compile_context>
chip_gen: v6e
topology: v6e:2x2x1
jax: 0.10.0
libtpu: 0.0.40
codegen_flags: <defaults>
</compile_context>

<pallas_src>
import jax
import jax.numpy as jnp
from jax import lax
from jax.experimental import pallas as pl
from jax.experimental.pallas import tpu as pltpu


def _round_up(n, m):
    return ((n + m - 1) // m) * m


def _cdiv(a, b):
    return -(-a // b)


# ----------------------------------------------------------------------------
# Kernel
# ----------------------------------------------------------------------------
def critic_kernel(x_ref, w1t_ref, b1_ref, w2t_ref, b2_ref, w3_ref, b3_ref,
                  out_ref):
    # x tile: [TB, D] (f32 or bf16) -> bf16 MXU operand; accumulation is f32.
    x = x_ref[...].astype(jnp.bfloat16)

    # fc_1 (transposed): h1^T = w1^T @ x^T  ->  [H1, TB].
    # Contraction over the last dim of BOTH operands (q @ k^T pattern), so no
    # explicit transpose of the x tile is required.
    h1 = lax.dot_general(
        w1t_ref[...], x,
        dimension_numbers=(((1,), (1,)), ((), ())),
        preferred_element_type=jnp.float32)
    h1 = jnp.maximum(h1 + b1_ref[...], 0.0)          # bias column [H1,1] + ReLU

    # fc_2 (transposed): h2^T = w2^T @ h1^T  ->  [H2, TB]; bf16 in / f32 acc.
    h2 = jnp.dot(w2t_ref[...], h1.astype(jnp.bfloat16),
                 preferred_element_type=jnp.float32)
    h2 = jnp.maximum(h2 + b2_ref[...], 0.0)

    # value head (out_features == 1): weight the H2 rows and reduce over the
    # sublane axis -> [TB], already lane-major.  b3 is an SMEM scalar.
    v = jnp.sum(h2 * w3_ref[...], axis=0) + b3_ref[0]
    out_ref[...] = v[None, None, :].astype(out_ref.dtype)   # lane-dense (1,1,TB)


# ----------------------------------------------------------------------------
# Tiling / VMEM sizing
# ----------------------------------------------------------------------------
def _vmem_limit_bytes():
    """Generation-aware VMEM limit: ~3/4 of physical, capped at 96 MiB.

    v5e/v6e (128 MiB physical) -> 96 MiB; v7x (64 MiB physical) -> 48 MiB.
    Falls back to a v7x-safe 48 MiB if the query is unavailable.
    """
    try:
        cap = int(pltpu.get_tpu_info().vmem_capacity_bytes)
    except Exception:
        cap = 64 * 1024 * 1024
    return min((cap * 3) // 4, 96 * 1024 * 1024)


def _choose_tiling(B, D, x_itemsize, H1, H2, vmem_limit, tb_max=4096):
    """Pick (G, TB) so TB is as large as VMEM allows, padding is minimal and
    the grid still splits across v7x's two TensorCores for large batches."""
    # Conservative VMEM bytes held per batch row during one grid step.
    per_row = (
        2 * D * x_itemsize        # double-buffered x tile
        + 2 * 4                   # double-buffered output row
        + (H1 + H2) * 4           # f32 h1^T / h2^T intermediates
        + (D + H1) * 2            # bf16 casts feeding the MXU
        + H2 * 4                  # value-head product before the reduce
        + 512)                    # slack (spills, fusion copies)
    # Resident weights/biases (counted double-buffered in case Buffered(1)
    # is unavailable and the fallback path is used).
    resident = 2 * (H1 * D * 2 + H2 * H1 * 2 + (H1 + 2 * H2) * 4)
    budget = vmem_limit - resident - 4 * 1024 * 1024
    tb_cap = max(128, min(tb_max, (budget // per_row) // 128 * 128))

    if B > tb_cap:
        G = _cdiv(B, tb_cap)      # >= 2; padding at most one sub-tile
    elif B >= 1024:
        G = 2                     # let v7x megacore split the batch; free on 1-TC chips
    else:
        G = 1

    if G > 1 or B >= 128:
        TB = _round_up(_cdiv(B, G), 128)   # multiple of 128 -> unmasked stores
    else:
        TB = _round_up(B, 8)               # tiny batch: one small tile
    return G, TB


# ----------------------------------------------------------------------------
# Wrapper
# ----------------------------------------------------------------------------
def critic_forward(x, params):
    """x: [B, D] float32 or bfloat16.  Returns value: [B] float32
    (matches the PyTorch module's `.reshape(-1)`)."""
    w1, b1, w2, b2, w3, b3 = params
    B, D = x.shape
    H1 = w1.shape[1]     # 128
    H2 = w2.shape[1]     # 256

    vmem_limit = _vmem_limit_bytes()
    x_itemsize = jnp.dtype(x.dtype).itemsize
    G, TB = _choose_tiling(B, D, x_itemsize, H1, H2, vmem_limit)
    B_pad = G * TB

    # --- one-time layout glue (weights are tiny, x keeps its dtype) ---------
    if B_pad != B:
        # Padded rows run the full network and produce finite garbage values;
        # they are sliced off by the trailing [:B] below — do NOT remove it.
        x = jnp.pad(x, ((0, B_pad - B), (0, 0)))
    w1t = w1.T.astype(jnp.bfloat16)                  # [H1, D]
    w2t = w2.T.astype(jnp.bfloat16)                  # [H2, H1]
    b1c = b1.reshape(H1, 1).astype(jnp.float32)      # bias columns (lane-broadcast)
    b2c = b2.reshape(H2, 1).astype(jnp.float32)
    w3c = w3.reshape(H2, 1).astype(jnp.float32)      # value head as a column
    b3s = b3.reshape(-1).astype(jnp.float32)         # (1,) SMEM scalar

    flops = 2 * B_pad * (D * H1 + H1 * H2 + H2)
    bytes_accessed = (
        B_pad * D * x_itemsize                       # x stream
        + 2 * (D * H1 + H1 * H2)                     # bf16 weights
        + 4 * (H1 + 2 * H2 + 1)                      # f32 bias cols + w3 + b3
        + 4 * B_pad)                                 # output
    cost = pl.CostEstimate(flops=flops, transcendentals=0,
                           bytes_accessed=bytes_accessed)

    def run(single_buffer_weights):
        # Resident operands (constant index_map) don't need double buffers;
        # single-buffering them frees VMEM headroom for a larger batch tile.
        res_kw = ({"pipeline_mode": pl.Buffered(1)}
                  if single_buffer_weights else {})
        grid_spec = pltpu.PrefetchScalarGridSpec(
            num_scalar_prefetch=0,
            grid=(G,),
            in_specs=[
                pl.BlockSpec((TB, D), lambda i: (i, 0)),              # x (pipelined)
                pl.BlockSpec((H1, D), lambda i: (0, 0), **res_kw),    # w1^T (resident)
                pl.BlockSpec((H1, 1), lambda i: (0, 0), **res_kw),    # b1 column
                pl.BlockSpec((H2, H1), lambda i: (0, 0), **res_kw),   # w2^T (resident)
                pl.BlockSpec((H2, 1), lambda i: (0, 0), **res_kw),    # b2 column
                pl.BlockSpec((H2, 1), lambda i: (0, 0), **res_kw),    # w3 column
                pl.BlockSpec(memory_space=pltpu.MemorySpace.SMEM),    # b3 scalar
            ],
            out_specs=pl.BlockSpec((1, 1, TB), lambda i: (i, 0, 0)),  # lane-dense
        )
        return pl.pallas_call(
            critic_kernel,
            out_shape=jax.ShapeDtypeStruct((G, 1, TB), jnp.float32),
            grid_spec=grid_spec,
            compiler_params=pltpu.CompilerParams(
                dimension_semantics=("parallel",),
                vmem_limit_bytes=vmem_limit),
            cost_estimate=cost,
        )(x, w1t, b1c, w2t, b2c, w3c, b3s)

    try:
        out = run(True)      # single-buffered resident weights
    except Exception:
        out = run(False)     # fall back to default (double-buffered) pipelining

    # (G, 1, TB) row-major tiles match padded batch order -> [B_pad] -> [B].
    return out.reshape(-1)[:B]


# ----------------------------------------------------------------------------
# Parameter init (PyTorch nn.Linear default: U(-1/sqrt(fan_in), 1/sqrt(fan_in)))
# ----------------------------------------------------------------------------
def init_params(key, input_dim):
    def linear(key, fan_in, fan_out):
        kw, kb = jax.random.split(key)
        bound = 1.0 / jnp.sqrt(fan_in)
        # stored as [in, out] so the reference computes x @ W + b
        w = jax.random.uniform(kw, (fan_in, fan_out), jnp.float32, -bound, bound)
        b = jax.random.uniform(kb, (1, fan_out), jnp.float32, -bound, bound)
        return w, b

    k1, k2, k3 = jax.random.split(key, 3)
    w1, b1 = linear(k1, input_dim, 128)
    w2, b2 = linear(k2, 128, 256)
    w3, b3 = linear(k3, 256, 1)
    return (w1, b1, w2, b2, w3, b3)


if __name__ == "__main__":
    key = jax.random.PRNGKey(0)
    k_params, k_x = jax.random.split(key)

    batch = 8
    input_dim = 32

    params = init_params(k_params, input_dim)
    x = jax.random.normal(k_x, (batch, input_dim), jnp.float32)

    value = jax.block_until_ready(critic_forward(x, params))
    assert value.shape == (batch,)

    w1, b1, w2, b2, w3, b3 = params

    # Matched-precision reference (bf16 matmul inputs, f32 accumulation).
    h1 = jnp.maximum(
        jnp.dot(x.astype(jnp.bfloat16), w1.astype(jnp.bfloat16),
                preferred_element_type=jnp.float32) + b1, 0.0)
    h2 = jnp.maximum(
        jnp.dot(h1.astype(jnp.bfloat16), w2.astype(jnp.bfloat16),
                preferred_element_type=jnp.float32) + b2, 0.0)
    ref_matched = jnp.sum(h2 * w3.reshape(1, -1), axis=-1) + b3.reshape(())

    # Full-f32 reference (exact PyTorch semantics).
    h1f = jnp.maximum(x @ w1 + b1, 0.0)
    h2f = jnp.maximum(h1f @ w2 + b2, 0.0)
    ref_f32 = (h2f @ w3 + b3).reshape(-1)

    assert jnp.allclose(value, ref_matched, atol=2e-3, rtol=2e-3)
    assert jnp.allclose(value, ref_f32, atol=5e-2, rtol=5e-2)

    print("KERNEL_OK")
</pallas_src>

<mosaic_0001>
module attributes {stable_mosaic.version = 11 : i64} {
  func.func @critic_kernel(%arg0: i32, %arg1: memref<8x32xf32, #tpu.memory_space<vmem>>, %arg2: memref<128x32xbf16, #tpu.memory_space<vmem>>, %arg3: memref<128x1xf32, #tpu.memory_space<vmem>>, %arg4: memref<256x128xbf16, #tpu.memory_space<vmem>>, %arg5: memref<256x1xf32, #tpu.memory_space<vmem>>, %arg6: memref<256x1xf32, #tpu.memory_space<vmem>>, %arg7: memref<1xf32, #tpu.memory_space<smem>>, %arg8: memref<1x1x8xf32, #tpu.memory_space<vmem>>) attributes {dimension_semantics = [#tpu.dimension_semantics<parallel>], iteration_bounds = array<i64: 1>, scalar_prefetch = 0 : i64, scratch_operands = 0 : i64, tpu.core_type = #tpu.core_type<tc>, window_params = [{transform_indices = @transform_0, window_bounds = array<i64: 8, 32>}, {pipeline_mode = #tpu.pipeline_mode<synchronous>, transform_indices = @transform_1, window_bounds = array<i64: 128, 32>}, {pipeline_mode = #tpu.pipeline_mode<synchronous>, transform_indices = @transform_2, window_bounds = array<i64: 128, 1>}, {pipeline_mode = #tpu.pipeline_mode<synchronous>, transform_indices = @transform_3, window_bounds = array<i64: 256, 128>}, {pipeline_mode = #tpu.pipeline_mode<synchronous>, transform_indices = @transform_4, window_bounds = array<i64: 256, 1>}, {pipeline_mode = #tpu.pipeline_mode<synchronous>, transform_indices = @transform_5, window_bounds = array<i64: 256, 1>}, {transform_indices = @transform_6, window_bounds = array<i64: 1>}, {transform_indices = @transform_7, window_bounds = array<i64: 1, 1, 8>}]} {
    %c0 = arith.constant 0 : index
    %c0_0 = arith.constant 0 : index
    %0 = vector.load %arg1[%c0, %c0_0] : memref<8x32xf32, #tpu.memory_space<vmem>>, vector<8x32xf32>
    %1 = arith.truncf %0 : vector<8x32xf32> to vector<8x32xbf16>
    %c0_1 = arith.constant 0 : index
    %c0_2 = arith.constant 0 : index
    %2 = vector.load %arg2[%c0_1, %c0_2] : memref<128x32xbf16, #tpu.memory_space<vmem>>, vector<128x32xbf16>
    %cst = arith.constant dense<0.000000e+00> : vector<128x8xf32>
    %3 = tpu.matmul %2, %1, %cst {dimension_numbers = #tpu.dot_dimension_numbers<[1], [1], [0], [0], [0, 0, 1, 0], [], []>} : vector<128x32xbf16>, vector<8x32xbf16>, vector<128x8xf32> -> vector<128x8xf32>
    %c0_3 = arith.constant 0 : index
    %c0_4 = arith.constant 0 : index
    %4 = vector.load %arg3[%c0_3, %c0_4] : memref<128x1xf32, #tpu.memory_space<vmem>>, vector<128x1xf32>
    %5 = vector.broadcast %4 : vector<128x1xf32> to vector<128x8xf32>
    %6 = arith.addf %3, %5 : vector<128x8xf32>
    %cst_5 = arith.constant 0.000000e+00 : f32
    %7 = vector.broadcast %cst_5 : f32 to vector<128x8xf32>
    %8 = arith.maximumf %6, %7 : vector<128x8xf32>
    %c0_6 = arith.constant 0 : index
    %c0_7 = arith.constant 0 : index
    %9 = vector.load %arg4[%c0_6, %c0_7] : memref<256x128xbf16, #tpu.memory_space<vmem>>, vector<256x128xbf16>
    %10 = arith.truncf %8 : vector<128x8xf32> to vector<128x8xbf16>
    %cst_8 = arith.constant dense<0.000000e+00> : vector<256x8xf32>
    %11 = tpu.matmul %9, %10, %cst_8 {dimension_numbers = #tpu.dot_dimension_numbers<[1], [0], [0], [1], [0, 0, 1, 1], [], []>} : vector<256x128xbf16>, vector<128x8xbf16>, vector<256x8xf32> -> vector<256x8xf32>
    %c0_9 = arith.constant 0 : index
    %c0_10 = arith.constant 0 : index
    %12 = vector.load %arg5[%c0_9, %c0_10] : memref<256x1xf32, #tpu.memory_space<vmem>>, vector<256x1xf32>
    %13 = vector.broadcast %12 : vector<256x1xf32> to vector<256x8xf32>
    %14 = arith.addf %11, %13 : vector<256x8xf32>
    %cst_11 = arith.constant 0.000000e+00 : f32
    %15 = vector.broadcast %cst_11 : f32 to vector<256x8xf32>
    %16 = arith.maximumf %14, %15 : vector<256x8xf32>
    %c0_12 = arith.constant 0 : index
    %c0_13 = arith.constant 0 : index
    %17 = vector.load %arg6[%c0_12, %c0_13] : memref<256x1xf32, #tpu.memory_space<vmem>>, vector<256x1xf32>
    %18 = vector.broadcast %17 : vector<256x1xf32> to vector<256x8xf32>
    %19 = arith.mulf %16, %18 : vector<256x8xf32>
    %cst_14 = arith.constant dense<0.000000e+00> : vector<8xf32>
    %20 = vector.multi_reduction <add>, %19, %cst_14 [0] : vector<256x8xf32> to vector<8xf32>
    %c0_15 = arith.constant 0 : index
    %21 = memref.load %arg7[%c0_15] : memref<1xf32, #tpu.memory_space<smem>>
    %22 = vector.broadcast %21 : f32 to vector<8xf32>
    %23 = arith.addf %20, %22 : vector<8xf32>
    %24 = vector.shape_cast %23 : vector<8xf32> to vector<1x1x8xf32>
    %c0_16 = arith.constant 0 : index
    %c0_17 = arith.constant 0 : index
    %c0_18 = arith.constant 0 : index
    %25 = vector.load %arg8[%c0_16, %c0_17, %c0_18] : memref<1x1x8xf32, #tpu.memory_space<vmem>>, vector<1x1x8xf32>
    tpu.vector_store %arg8[%c0_16, %c0_17, %c0_18], %24 {strides = array<i32>} : memref<1x1x8xf32, #tpu.memory_space<vmem>>, vector<1x1x8xf32>,
    return
  }
  func.func @transform_0(%arg0: i32) -> (i32, i32) {
    %c0_i32 = arith.constant 0 : i32
    %c0_i32_0 = arith.constant 0 : i32
    return %arg0, %c0_i32 : i32, i32
  }
  func.func @transform_1(%arg0: i32) -> (i32, i32) {
    %c0_i32 = arith.constant 0 : i32
    %c0_i32_0 = arith.constant 0 : i32
    %c0_i32_1 = arith.constant 0 : i32
    return %c0_i32, %c0_i32_0 : i32, i32
  }
  func.func @transform_2(%arg0: i32) -> (i32, i32) {
    %c0_i32 = arith.constant 0 : i32
    %c0_i32_0 = arith.constant 0 : i32
    %c0_i32_1 = arith.constant 0 : i32
    return %c0_i32, %c0_i32_0 : i32, i32
  }
  func.func @transform_3(%arg0: i32) -> (i32, i32) {
    %c0_i32 = arith.constant 0 : i32
    %c0_i32_0 = arith.constant 0 : i32
    %c0_i32_1 = arith.constant 0 : i32
    return %c0_i32, %c0_i32_0 : i32, i32
  }
  func.func @transform_4(%arg0: i32) -> (i32, i32) {
    %c0_i32 = arith.constant 0 : i32
    %c0_i32_0 = arith.constant 0 : i32
    %c0_i32_1 = arith.constant 0 : i32
    return %c0_i32, %c0_i32_0 : i32, i32
  }
  func.func @transform_5(%arg0: i32) -> (i32, i32) {
    %c0_i32 = arith.constant 0 : i32
    %c0_i32_0 = arith.constant 0 : i32
    %c0_i32_1 = arith.constant 0 : i32
    return %c0_i32, %c0_i32_0 : i32, i32
  }
  func.func @transform_6(%arg0: i32) -> i32 {
    %c0_i32 = arith.constant 0 : i32
    %c0_i32_0 = arith.constant 0 : i32
    return %c0_i32 : i32
  }
  func.func @transform_7(%arg0: i32) -> (i32, i32, i32) {
    %c0_i32 = arith.constant 0 : i32
    %c0_i32_0 = arith.constant 0 : i32
    %c0_i32_1 = arith.constant 0 : i32
    return %arg0, %c0_i32, %c0_i32_0 : i32, i32, i32
  }
}

module attributes {stable_mosaic.version = 11 : i64} {
  func.func @critic_kernel(%arg0: i32, %arg1: memref<8x32xf32, #tpu.memory_space<vmem>>, %arg2: memref<128x32xbf16, #tpu.memory_space<vmem>>, %arg3: memref<128x1xf32, #tpu.memory_space<vmem>>, %arg4: memref<256x128xbf16, #tpu.memory_space<vmem>>, %arg5: memref<256x1xf32, #tpu.memory_space<vmem>>, %arg6: memref<256x1xf32, #tpu.memory_space<vmem>>, %arg7: memref<1xf32, #tpu.memory_space<smem>>, %arg8: memref<1x1x8xf32, #tpu.memory_space<vmem>>) attributes {dimension_semantics = [#tpu.dimension_semantics<parallel>], iteration_bounds = array<i64: 1>, scalar_prefetch = 0 : i64, scratch_operands = 0 : i64, tpu.core_type = #tpu.core_type<tc>, window_params = [{transform_indices = @transform_0, window_bounds = array<i64: 8, 32>}, {pipeline_mode = #tpu.pipeline_mode<synchronous>, transform_indices = @transform_1, window_bounds = array<i64: 128, 32>}, {pipeline_mode = #tpu.pipeline_mode<synchronous>, transform_indices = @transform_2, window_bounds = array<i64: 128, 1>}, {pipeline_mode = #tpu.pipeline_mode<synchronous>, transform_indices = @transform_3, window_bounds = array<i64: 256, 128>}, {pipeline_mode = #tpu.pipeline_mode<synchronous>, transform_indices = @transform_4, window_bounds = array<i64: 256, 1>}, {pipeline_mode = #tpu.pipeline_mode<synchronous>, transform_indices = @transform_5, window_bounds = array<i64: 256, 1>}, {transform_indices = @transform_6, window_bounds = array<i64: 1>}, {transform_indices = @transform_7, window_bounds = array<i64: 1, 1, 8>}]} {
    %c0 = arith.constant 0 : index
    %c0_0 = arith.constant 0 : index
    %0 = vector.load %arg1[%c0, %c0_0] : memref<8x32xf32, #tpu.memory_space<vmem>>, vector<8x32xf32>
    %1 = arith.truncf %0 : vector<8x32xf32> to vector<8x32xbf16>
    %c0_1 = arith.constant 0 : index
    %c0_2 = arith.constant 0 : index
    %2 = vector.load %arg2[%c0_1, %c0_2] : memref<128x32xbf16, #tpu.memory_space<vmem>>, vector<128x32xbf16>
    %cst = arith.constant dense<0.000000e+00> : vector<128x8xf32>
    %3 = tpu.matmul %2, %1, %cst {dimension_numbers = #tpu.dot_dimension_numbers<[1], [1], [0], [0], [0, 0, 1, 0], [], []>} : vector<128x32xbf16>, vector<8x32xbf16>, vector<128x8xf32> -> vector<128x8xf32>
    %c0_3 = arith.constant 0 : index
    %c0_4 = arith.constant 0 : index
    %4 = vector.load %arg3[%c0_3, %c0_4] : memref<128x1xf32, #tpu.memory_space<vmem>>, vector<128x1xf32>
    %5 = vector.broadcast %4 : vector<128x1xf32> to vector<128x8xf32>
    %6 = arith.addf %3, %5 : vector<128x8xf32>
    %cst_5 = arith.constant 0.000000e+00 : f32
    %7 = vector.broadcast %cst_5 : f32 to vector<128x8xf32>
    %8 = arith.maximumf %6, %7 : vector<128x8xf32>
    %c0_6 = arith.constant 0 : index
    %c0_7 = arith.constant 0 : index
    %9 = vector.load %arg4[%c0_6, %c0_7] : memref<256x128xbf16, #tpu.memory_space<vmem>>, vector<256x128xbf16>
    %10 = arith.truncf %8 : vector<128x8xf32> to vector<128x8xbf16>
    %cst_8 = arith.constant dense<0.000000e+00> : vector<256x8xf32>
    %11 = tpu.matmul %9, %10, %cst_8 {dimension_numbers = #tpu.dot_dimension_numbers<[1], [0], [0], [1], [0, 0, 1, 1], [], []>} : vector<256x128xbf16>, vector<128x8xbf16>, vector<256x8xf32> -> vector<256x8xf32>
    %c0_9 = arith.constant 0 : index
    %c0_10 = arith.constant 0 : index
    %12 = vector.load %arg5[%c0_9, %c0_10] : memref<256x1xf32, #tpu.memory_space<vmem>>, vector<256x1xf32>
    %13 = vector.broadcast %12 : vector<256x1xf32> to vector<256x8xf32>
    %14 = arith.addf %11, %13 : vector<256x8xf32>
    %cst_11 = arith.constant 0.000000e+00 : f32
    %15 = vector.broadcast %cst_11 : f32 to vector<256x8xf32>
    %16 = arith.maximumf %14, %15 : vector<256x8xf32>
    %c0_12 = arith.constant 0 : index
    %c0_13 = arith.constant 0 : index
    %17 = vector.load %arg6[%c0_12, %c0_13] : memref<256x1xf32, #tpu.memory_space<vmem>>, vector<256x1xf32>
    %18 = vector.broadcast %17 : vector<256x1xf32> to vector<256x8xf32>
    %19 = arith.mulf %16, %18 : vector<256x8xf32>
    %cst_14 = arith.constant dense<0.000000e+00> : vector<8xf32>
    %20 = vector.multi_reduction <add>, %19, %cst_14 [0] : vector<256x8xf32> to vector<8xf32>
    %c0_15 = arith.constant 0 : index
    %21 = memref.load %arg7[%c0_15] : memref<1xf32, #tpu.memory_space<smem>>
    %22 = vector.broadcast %21 : f32 to vector<8xf32>
    %23 = arith.addf %20, %22 : vector<8xf32>
    %24 = vector.shape_cast %23 : vector<8xf32> to vector<1x1x8xf32>
    %c0_16 = arith.constant 0 : index
    %c0_17 = arith.constant 0 : index
    %c0_18 = arith.constant 0 : index
    %25 = vector.load %arg8[%c0_16, %c0_17, %c0_18] : memref<1x1x8xf32, #tpu.memory_space<vmem>>, vector<1x1x8xf32>
    tpu.vector_store %arg8[%c0_16, %c0_17, %c0_18], %24 {strides = array<i32>} : memref<1x1x8xf32, #tpu.memory_space<vmem>>, vector<1x1x8xf32>,
    return
  }
  func.func @transform_0(%arg0: i32) -> (i32, i32) {
    %c0_i32 = arith.constant 0 : i32
    %c0_i32_0 = arith.constant 0 : i32
    return %arg0, %c0_i32 : i32, i32
  }
  func.func @transform_1(%arg0: i32) -> (i32, i32) {
    %c0_i32 = arith.constant 0 : i32
    %c0_i32_0 = arith.constant 0 : i32
    %c0_i32_1 = arith.constant 0 : i32
    return %c0_i32, %c0_i32_0 : i32, i32
  }
  func.func @transform_2(%arg0: i32) -> (i32, i32) {
    %c0_i32 = arith.constant 0 : i32
    %c0_i32_0 = arith.constant 0 : i32
    %c0_i32_1 = arith.constant 0 : i32
    return %c0_i32, %c0_i32_0 : i32, i32
  }
  func.func @transform_3(%arg0: i32) -> (i32, i32) {
    %c0_i32 = arith.constant 0 : i32
    %c0_i32_0 = arith.constant 0 : i32
    %c0_i32_1 = arith.constant 0 : i32
    return %c0_i32, %c0_i32_0 : i32, i32
  }
  func.func @transform_4(%arg0: i32) -> (i32, i32) {
    %c0_i32 = arith.constant 0 : i32
    %c0_i32_0 = arith.constant 0 : i32
    %c0_i32_1 = arith.constant 0 : i32
    return %c0_i32, %c0_i32_0 : i32, i32
  }
  func.func @transform_5(%arg0: i32) -> (i32, i32) {
    %c0_i32 = arith.constant 0 : i32
    %c0_i32_0 = arith.constant 0 : i32
    %c0_i32_1 = arith.constant 0 : i32
    return %c0_i32, %c0_i32_0 : i32, i32
  }
  func.func @transform_6(%arg0: i32) -> i32 {
    %c0_i32 = arith.constant 0 : i32
    %c0_i32_0 = arith.constant 0 : i32
    return %c0_i32 : i32
  }
  func.func @transform_7(%arg0: i32) -> (i32, i32, i32) {
    %c0_i32 = arith.constant 0 : i32
    %c0_i32_0 = arith.constant 0 : i32
    %c0_i32_1 = arith.constant 0 : i32
    return %arg0, %c0_i32, %c0_i32_0 : i32, i32, i32
  }
}

</mosaic_0001>

<bundles_post_ra>
// kernel: tpu_custom_call.1
= control target key start
LH: loop header
LB: loop body
LE: loop exit
PB: predicated region body
PF: predicated region fallthrough
CT: control target
= control target key end

     0   :  { %vm183_vm0 = vcmask 261120   ;;  %v1356_v3 = vmov 0   ;;  %s1923_s0 = inlined_call_operand.vmem [shape: f32[8,32], index: 0, kind: input, shape index: {}]   ;;  %s1924_s1 = inlined_call_operand.vmem [shape: bf16[128,32], index: 1, kind: input, shape index: {}]   ;;  %s1925_s2 = inlined_call_operand.vmem [shape: f32[128,1], index: 2, kind: input, shape index: {}]   ;;  %s1926_s3 = inlined_call_operand.vmem [shape: bf16[256,128], index: 3, kind: input, shape index: {}]   ;;  %s1927_s4 = inlined_call_operand.vmem [shape: f32[256,1], index: 4, kind: input, shape index: {}]   ;;  %s1928_s5 = inlined_call_operand.vmem [shape: f32[256,1], index: 5, kind: input, shape index: {}]   ;;  %s1929_s6 = inlined_call_operand.<no memory space> [shape: f32[1], index: 6, kind: input, shape index: {}]   ;;  %s1930_s7 = inlined_call_operand.hbm [shape: f32[1,1,8], index: 7, kind: output, shape index: {}]  }
   0x1   :  { %v61_v0 = vld [vmem:[%s1925_s2 + $0x70] sm:$0xff]  ;;  %v59_v1 = vld [vmem:[%s1925_s2 + $0x60] sm:$0xff]  ;;  %1309 = vset.pattern.permute.xlu1 %v1356_v3  ;;  %1308 = vset.pattern.permute.xlu0 %v1356_v3  ;;  %v62_v5 = vld [vmem:[%s1925_s2 + $0x78] sm:$0xff] }
   0x2   :  { %v29_v2 = vld [vmem:[%s1923_s0] sm:$0xff]  ;;  %135 = vperm.xlu0 %1308, %v61_v0   ;;  %125 = vperm.xlu1 %1309, %v59_v1   ;;  %v60_v6 = vld [vmem:[%s1925_s2 + $0x68] sm:$0xff]  ;;  %v58_v9 = vld [vmem:[%s1925_s2 + $0x58] sm:$0xff] }
   0x3   :  { %v30_v4 = vpack.c.bf16 %v29_v2, %v29_v2  ;;  %v1310_v8 = vld [vmem:[%s1924_s1] sm:$0xff]   ;;  %v57_v10 = vld [vmem:[%s1925_s2 + $0x50] sm:$0xff]  ;;  %v1311_v11 = vld [vmem:[%s1924_s1 + $0x8] sm:$0xff]  }
   0x4   :  { %1225 = vmatprep.mubr.msk.bf16.mxu0 %vm183_vm0, %v1310_v8  ;;  %v1312_v12 = vld [vmem:[%s1924_s1 + $0x10] sm:$0xff]   ;;  %v56_v13 = vld [vmem:[%s1925_s2 + $0x48] sm:$0xff]  ;;  %v55_v14 = vld [vmem:[%s1925_s2 + $0x40] sm:$0xff] }
   0x5   :  { %1305 = vmatprep.subr.msk.bf16.mxu0 %vm183_vm0, %v30_v4  ;;  %v209_v7 = vsel %vm183_vm0, %v30_v4, 0  ;;  %v54_v15 = vld [vmem:[%s1925_s2 + $0x38] sm:$0xff]  ;;  %v53_v16 = vld [vmem:[%s1925_s2 + $0x30] sm:$0xff]  ;;  %v1314_v18 = vld [vmem:[%s1924_s1 + $0x20] sm:$0xff]  }
   0x6   :  { %1224 = vmatpush3.bf16.xpose.msra.mxu0 %v209_v7  ;;  %140 = vperm.xlu0 %1308, %v62_v5   ;;  %v1313_v17 = vld [vmem:[%s1924_s1 + $0x18] sm:$0xff]   ;;  %v52_v19 = vld [vmem:[%s1925_s2 + $0x28] sm:$0xff]  ;;  %v51_v20 = vld [vmem:[%s1925_s2 + $0x20] sm:$0xff] }
   0x7   :  { %130 = vperm.xlu1 %1309, %v60_v6   ;;  %v50_v21 = vld [vmem:[%s1925_s2 + $0x18] sm:$0xff]  ;;  %v49_v22 = vld [vmem:[%s1925_s2 + $0x10] sm:$0xff]  ;;  %v1315_v23 = vld [vmem:[%s1924_s1 + $0x28] sm:$0xff]  }
   0x8   :  { %v1316_v24 = vld [vmem:[%s1924_s1 + $0x30] sm:$0xff]   ;;  %v48_v25 = vld [vmem:[%s1925_s2 + $0x8] sm:$0xff]  ;;  %v47_v26 = vld [vmem:[%s1925_s2] sm:$0xff] }
   0x9   :  { %v365_v27 = vld [vmem:[%s1927_s4 + $0x8] sm:$0xff]  ;;  %v364_v28 = vld [vmem:[%s1927_s4] sm:$0xff]  ;;  %v1317_v29 = vld [vmem:[%s1924_s1 + $0x38] sm:$0xff]  }
   0xa   :  { %115 = vperm.xlu0 %1308, %v57_v10   ;;  %v367_v30 = vld [vmem:[%s1927_s4 + $0x18] sm:$0xff]  ;;  %v366_v31 = vld [vmem:[%s1927_s4 + $0x10] sm:$0xff]  ;;  %v369_v32 = vld [vmem:[%s1927_s4 + $0x28] sm:$0xff] }
   0xb   :  { %120 = vperm.xlu1 %1309, %v58_v9   ;;  %v368_v33 = vld [vmem:[%s1927_s4 + $0x20] sm:$0xff]  ;;  %v371_v34 = vld [vmem:[%s1927_s4 + $0x38] sm:$0xff]  ;;  %v370_v35 = vld [vmem:[%s1927_s4 + $0x30] sm:$0xff] }
   0xd   :  { %1226 = vmatmul.mubr.msk.bf16.vlgmr.msra.gmra.mxu0 %vm183_vm0, %v1311_v11 }
   0xe   :  { %1229 = vmatprep.mubr.msk.bf16.mxu0 %vm183_vm0, %v1312_v12  ;;  %105 = vperm.xlu0 %1308, %v55_v14  }
   0xf   :  { %110 = vperm.xlu1 %1309, %v56_v13  }
  0x12   :  { %95 = vperm.xlu0 %1308, %v53_v16  }
  0x13   :  { %100 = vperm.xlu1 %1309, %v54_v15  }
  0x15   :  { %1230 = vmatmul.mubr.msk.bf16.gmra.mxu0 %vm183_vm0, %v1313_v17 }
  0x16   :  { %1233 = vmatprep.mubr.msk.bf16.mxu0 %vm183_vm0, %v1314_v18  ;;  %85 = vperm.xlu0 %1308, %v51_v20  }
  0x17   :  { %90 = vperm.xlu1 %1309, %v52_v19  }
  0x1a   :  { %75 = vperm.xlu0 %1308, %v49_v22  }
  0x1b   :  { %80 = vperm.xlu1 %1309, %v50_v21  }
  0x1d   :  { %1234 = vmatmul.mubr.msk.bf16.gmra.mxu0 %vm183_vm0, %v1315_v23 }
  0x1e   :  { %1237 = vmatprep.mubr.msk.bf16.mxu0 %vm183_vm0, %v1316_v24  ;;  %65 = vperm.xlu0 %1308, %v47_v26  }
  0x1f   :  { %70 = vperm.xlu1 %1309, %v48_v25  }
  0x22   :  { %398 = vperm.xlu0 %1308, %v364_v28  }
  0x23   :  { %403 = vperm.xlu1 %1309, %v365_v27  }
  0x25   :  { %1238 = vmatmul.mubr.msk.bf16.gmra.mxu0 %vm183_vm0, %v1317_v29 }
  0x26   :  { %408 = vperm.xlu0 %1308, %v366_v31  }
  0x27   :  { %413 = vperm.xlu1 %1309, %v367_v30  }
  0x2a   :  { %418 = vperm.xlu0 %1308, %v368_v33  }
  0x2b   :  { %423 = vperm.xlu1 %1309, %v369_v32  }
  0x2c   :  { %13 = vsyncpa [#allocation4], 0  ;;  %v373_v36 = vld [vmem:[%s1927_s4 + $0x48] sm:$0xff]  ;;  %v372_v37 = vld [vmem:[%s1927_s4 + $0x40] sm:$0xff]  ;;  %vm1069_vm1 = vcmask 64512   ;;  %vm1142_vm2 = vcmask 57344  }
  0x2d   :  { %v375_v38 = vld [vmem:[%s1927_s4 + $0x58] sm:$0xff]  ;;  %v374_v39 = vld [vmem:[%s1927_s4 + $0x50] sm:$0xff]  ;;  %v377_v40 = vld [vmem:[%s1927_s4 + $0x68] sm:$0xff] }
  0x2e   :  { %428 = vperm.xlu0 %1308, %v370_v35   ;;  %v376_v41 = vld [vmem:[%s1927_s4 + $0x60] sm:$0xff]  ;;  %v379_v42 = vld [vmem:[%s1927_s4 + $0x78] sm:$0xff]  ;;  %v378_v43 = vld [vmem:[%s1927_s4 + $0x70] sm:$0xff] }
  0x2f   :  { %433 = vperm.xlu1 %1309, %v371_v34   ;;  %v381_v44 = vld [vmem:[%s1927_s4 + $0x88] sm:$0xff]  ;;  %v380_v45 = vld [vmem:[%s1927_s4 + $0x80] sm:$0xff]  ;;  %v383_v46 = vld [vmem:[%s1927_s4 + $0x98] sm:$0xff] }
  0x30   :  { %v382_v47 = vld [vmem:[%s1927_s4 + $0x90] sm:$0xff]  ;;  %v385_v48 = vld [vmem:[%s1927_s4 + $0xa8] sm:$0xff]  ;;  %v384_v49 = vld [vmem:[%s1927_s4 + $0xa0] sm:$0xff] }
  0x31   :  { %v387_v50 = vld [vmem:[%s1927_s4 + $0xb8] sm:$0xff]  ;;  %v386_v51 = vld [vmem:[%s1927_s4 + $0xb0] sm:$0xff]  ;;  %v389_v52 = vld [vmem:[%s1927_s4 + $0xc8] sm:$0xff] }
  0x32   :  { %438 = vperm.xlu0 %1308, %v372_v37   ;;  %v388_v53 = vld [vmem:[%s1927_s4 + $0xc0] sm:$0xff]  ;;  %v391_v54 = vld [vmem:[%s1927_s4 + $0xd8] sm:$0xff]  ;;  %v390_v55 = vld [vmem:[%s1927_s4 + $0xd0] sm:$0xff] }
  0x33   :  { %443 = vperm.xlu1 %1309, %v373_v36   ;;  %v845_v56 = vld [vmem:[%s1928_s5] sm:$0xff]  ;;  %v847_v58 = vld [vmem:[%s1928_s5 + $0x10] sm:$0xff]  ;;  %v846_v59 = vld [vmem:[%s1928_s5 + $0x8] sm:$0xff] }
  0x34   :  { %v392_v57 = vld [vmem:[%s1927_s4 + $0xe0] sm:$0xff]  ;;  %v848_v61 = vld [vmem:[%s1928_s5 + $0x18] sm:$0xff]  ;;  %v851_v62 = vld [vmem:[%s1928_s5 + $0x30] sm:$0xff] }
  0x35   :  { %v849_v60 = vld [vmem:[%s1928_s5 + $0x20] sm:$0xff]  ;;  %v850_v63 = vld [vmem:[%s1928_s5 + $0x28] sm:$0xff]  ;;  %v852_v1 = vld [vmem:[%s1928_s5 + $0x38] sm:$0xff] }
  0x36   :  { %448 = vperm.xlu0 %1308, %v374_v39   ;;  %v853_v0 = vld [vmem:[%s1928_s5 + $0x40] sm:$0xff]  ;;  %v855_v2 = vld [vmem:[%s1928_s5 + $0x50] sm:$0xff]  ;;  %v854_v3 = vld [vmem:[%s1928_s5 + $0x48] sm:$0xff] }
  0x37   :  { %453 = vperm.xlu1 %1309, %v375_v38   ;;  %v857_v4 = vld [vmem:[%s1928_s5 + $0x60] sm:$0xff]  ;;  %v856_v5 = vld [vmem:[%s1928_s5 + $0x58] sm:$0xff]  ;;  %v859_v6 = vld [vmem:[%s1928_s5 + $0x70] sm:$0xff] }
  0x38   :  { %v858_v7 = vld [vmem:[%s1928_s5 + $0x68] sm:$0xff]  ;;  %v861_v8 = vld [vmem:[%s1928_s5 + $0x80] sm:$0xff]  ;;  %v860_v9 = vld [vmem:[%s1928_s5 + $0x78] sm:$0xff] }
  0x39   :  { %v863_v10 = vld [vmem:[%s1928_s5 + $0x90] sm:$0xff]  ;;  %v862_v11 = vld [vmem:[%s1928_s5 + $0x88] sm:$0xff]  ;;  %v865_v12 = vld [vmem:[%s1928_s5 + $0xa0] sm:$0xff] }
  0x3a   :  { %458 = vperm.xlu0 %1308, %v376_v41   ;;  %v864_v13 = vld [vmem:[%s1928_s5 + $0x98] sm:$0xff]  ;;  %v867_v14 = vld [vmem:[%s1928_s5 + $0xb0] sm:$0xff]  ;;  %v866_v15 = vld [vmem:[%s1928_s5 + $0xa8] sm:$0xff] }
  0x3b   :  { %463 = vperm.xlu1 %1309, %v377_v40   ;;  %v869_v16 = vld [vmem:[%s1928_s5 + $0xc0] sm:$0xff]  ;;  %v868_v17 = vld [vmem:[%s1928_s5 + $0xb8] sm:$0xff]  ;;  %v871_v18 = vld [vmem:[%s1928_s5 + $0xd0] sm:$0xff] }
  0x3c   :  { %v870_v19 = vld [vmem:[%s1928_s5 + $0xc8] sm:$0xff]  ;;  %v1318_v20 = vld [vmem:[%s1926_s3 + $0x30] sm:$0xff]   ;;  %v1319_v21 = vld [vmem:[%s1926_s3] sm:$0xff]  }
  0x3d   :  { %v872_v22 = vld [vmem:[%s1928_s5 + $0xd8] sm:$0xff]  ;;  %v393_v23 = vld [vmem:[%s1927_s4 + $0xe8] sm:$0xff]  ;;  %1269 = vmatprep.mubr.bf16.mxu1 %v1318_v20  ;;  %1257 = vmatprep.mubr.bf16.mxu0 %v1319_v21  ;;  %v873_v24 = vld [vmem:[%s1928_s5 + $0xe0] sm:$0xff] }
  0x3e   :  { %468 = vperm.xlu0 %1308, %v378_v43   ;;  %v394_v25 = vld [vmem:[%s1927_s4 + $0xf0] sm:$0xff]  ;;  %v874_v26 = vld [vmem:[%s1928_s5 + $0xe8] sm:$0xff]  ;;  %v395_v27 = vld [vmem:[%s1927_s4 + $0xf8] sm:$0xff] }
  0x3f   :  { %473 = vperm.xlu1 %1309, %v379_v42   ;;  %v876_v28 = vld [vmem:[%s1928_s5 + $0xf8] sm:$0xff]  ;;  %v875_v29 = vld [vmem:[%s1928_s5 + $0xf0] sm:$0xff]  ;;  %s1357_s5 = smov [#allocation3]  }
  0x40   :  { %s1150_s28 = sshll.u32 %s1357_s5, 4  ;;  %s1151_s28 = int_to_ptr.vmem [resolvable:$true] %s1150_s28 }
  0x41   :  { %s1334_s29 = scalar_lea.vmem %s1151_s28, 16  ;;  %s1338_s30 = scalar_lea.vmem %s1151_s28, 32 }
  0x42   :  { %478 = vperm.xlu0 %1308, %v380_v45   ;;  %p1335_p0 = scmp.ne.s32.totalorder %s1151_s28, %s1334_s29  ;;  %p1339_p1 = scmp.lt.s32.totalorder %s1151_s28, %s1151_s28 }
  0x43   :  { %483 = vperm.xlu1 %1309, %v381_v44   ;;  %p1340_p2 = scmp.lt.s32.totalorder %s1338_s30, %s1334_s29 }
  0x45   :  { %p1341_p3 = por %p1340_p2, %p1339_p1 }
  0x46   :  { %488 = vperm.xlu0 %1308, %v382_v47  }
  0x47   :  { %493 = vperm.xlu1 %1309, %v383_v46   ;;  %p1342_p4 = pnand %p1341_p3, %p1335_p0 }
  0x4a   :  { %498 = vperm.xlu0 %1308, %v384_v49  }
  0x4b   :  { %503 = vperm.xlu1 %1309, %v385_v48  }
  0x4e   :  { %508 = vperm.xlu0 %1308, %v386_v51  }
  0x4f   :  { %513 = vperm.xlu1 %1309, %v387_v50  }
  0x52   :  { %518 = vperm.xlu0 %1308, %v388_v53  }
  0x53   :  { %523 = vperm.xlu1 %1309, %v389_v52  }
  0x56   :  { %528 = vperm.xlu0 %1308, %v390_v55  }
  0x57   :  { %533 = vperm.xlu1 %1309, %v391_v54  }
  0x5a   :  { %538 = vperm.xlu0 %1308, %v392_v57  }
  0x5b   :  { %879 = vperm.xlu1 %1309, %v845_v56  }
  0x5e   :  { %884 = vperm.xlu0 %1308, %v846_v59  }
  0x5f   :  { %889 = vperm.xlu1 %1309, %v847_v58  }
  0x62   :  { %894 = vperm.xlu0 %1308, %v848_v61  }
  0x63   :  { %899 = vperm.xlu1 %1309, %v849_v60  }
  0x66   :  { %904 = vperm.xlu0 %1308, %v850_v63  }
  0x67   :  { %909 = vperm.xlu1 %1309, %v851_v62  }
  0x6a   :  { %914 = vperm.xlu0 %1308, %v852_v1  }
  0x6b   :  { %919 = vperm.xlu1 %1309, %v853_v0  }
  0x6e   :  { %924 = vperm.xlu0 %1308, %v854_v3  }
  0x6f   :  { %929 = vperm.xlu1 %1309, %v855_v2  }
  0x72   :  { %934 = vperm.xlu0 %1308, %v856_v5  }
  0x73   :  { %939 = vperm.xlu1 %1309, %v857_v4  }
  0x76   :  { %944 = vperm.xlu0 %1308, %v858_v7  }
  0x77   :  { %949 = vperm.xlu1 %1309, %v859_v6  }
  0x7a   :  { %954 = vperm.xlu0 %1308, %v860_v9  }
  0x7b   :  { %959 = vperm.xlu1 %1309, %v861_v8  }
  0x7d   :  { %v126_v34 = vpop.permute.xlu1 %125  ;;  %v136_v36 = vpop.permute.xlu0 %135 }
  0x7e   :  { %964 = vperm.xlu0 %1308, %v862_v11  }
  0x7f   :  { %969 = vperm.xlu1 %1309, %v863_v10  }
  0x81   :  { %v141_v41 = vpop.permute.xlu0 %140 }
  0x82   :  { %974 = vperm.xlu0 %1308, %v864_v13   ;;  %v131_v39 = vpop.permute.xlu1 %130 }
  0x83   :  { %979 = vperm.xlu1 %1309, %v865_v12  }
  0x85   :  { %v116_v46 = vpop.permute.xlu0 %115 }
  0x86   :  { %984 = vperm.xlu0 %1308, %v866_v15   ;;  %v121_v44 = vpop.permute.xlu1 %120 }
  0x87   :  { %989 = vperm.xlu1 %1309, %v867_v14  }
  0x89   :  { %v106_v52 = vpop.permute.xlu0 %105 }
  0x8a   :  { %994 = vperm.xlu0 %1308, %v868_v17   ;;  %v111_v49 = vpop.permute.xlu1 %110 }
  0x8b   :  { %999 = vperm.xlu1 %1309, %v869_v16  }
  0x8d   :  { %v96_v2 = vpop.permute.xlu0 %95 }
  0x8e   :  { %1004 = vperm.xlu0 %1308, %v870_v19   ;;  %v101_v61 = vpop.permute.xlu1 %100 }
  0x8f   :  { %1009 = vperm.xlu1 %1309, %v871_v18  }
  0x91   :  { %v86_v12 = vpop.permute.xlu0 %85 }
  0x92   :  { %543 = vperm.xlu0 %1308, %v393_v23   ;;  %v91_v8 = vpop.permute.xlu1 %90 }
  0x93   :  { %1014 = vperm.xlu1 %1309, %v872_v22  }
  0x95   :  { %v76_v21 = vpop.permute.xlu0 %75 }
  0x96   :  { %548 = vperm.xlu0 %1308, %v394_v25   ;;  %v81_v18 = vpop.permute.xlu1 %80 }
  0x97   :  { %1019 = vperm.xlu1 %1309, %v873_v24  }
  0x9a   :  { %553 = vperm.xlu0 %1308, %v395_v27   ;;  %v71_v27 = vpop.permute.xlu1 %70 }
  0x9b   :  { %1024 = vperm.xlu1 %1309, %v874_v26  }
  0x9e   :  { %1029 = vperm.xlu0 %1308, %v875_v29  }
  0x9f   :  { %1034 = vperm.xlu1 %1309, %v876_v28  }
  0xcd   :  { %v1681_v30 = vpop.f32.mrf.mxu0 }
  0xce   :  { %v254_v25 = vadd.f32 %v1681_v30, %v76_v21 }
  0xcf   :  { %v1683_v31 = vpop.f32.mrf.mxu0 }
  0xd1   :  { %v1685_v32 = vpop.f32.mrf.mxu0 }
  0xd2   :  { %v257_v22 = vadd.f32 %v1685_v32, %v81_v18 }
  0xd3   :  { %v1687_v33 = vpop.f32.mrf.mxu0 }
  0xd4   :  { %v311_v28 = vmax.f32 %v257_v22, 0.0  ;;  %v249_v29 = vadd.f32 %v1687_v33, %v71_v27  ;;  %v1320_v33 = vld [vmem:[%s1926_s3 + $0x8] sm:$0xff]  }
  0xd5   :  { %v1231_v35 = vpop.f32.mrf.mxu0 }
  0xd6   :  { %v270_v13 = vadd.f32 %v1231_v35, %v96_v2  ;;  %v66_v35 = vpop.permute.xlu0 %65 }
  0xd7   :  { %v261_v37 = vpop.f32.mrf.mxu0  ;;  %v246_v32 = vadd.f32 %v1683_v31, %v66_v35  ;;  %v1321_v31 = vld [vmem:[%s1926_s3 + $0x38] sm:$0xff]  }
  0xd8   :  { %v314_v19 = vmax.f32 %v270_v13, 0.0  ;;  %v262_v20 = vadd.f32 %v261_v37, %v86_v12 }
  0xd9   :  { %v1232_v38 = vpop.f32.mrf.mxu0  ;;  %v308_v30 = vmax.f32 %v246_v32, 0.0 }
  0xda   :  { %v273_v9 = vadd.f32 %v1232_v38, %v101_v61  ;;  %v312_v26 = vmax.f32 %v262_v20, 0.0  ;;  %v309_v38 = vmax.f32 %v249_v29, 0.0 }
  0xdb   :  { %v264_v40 = vpop.f32.mrf.mxu0 }
  0xdc   :  { %v315_v15 = vmax.f32 %v273_v9, 0.0  ;;  %v265_v16 = vadd.f32 %v264_v40, %v91_v8  ;;  %v1322_v40 = vld [vmem:[%s1926_s3 + $0x10] sm:$0xff]  }
  0xdd   :  { %v1235_v42 = vpop.f32.mrf.mxu0 }
  0xde   :  { %v286_v62 = vadd.f32 %v1235_v42, %v116_v46  ;;  %v359_v23 = vpack.c.bf16 %v315_v15, %v314_v19  ;;  %v313_v24 = vmax.f32 %v265_v16, 0.0  ;;  %v1324_v42 = vld [vmem:[%s1926_s3 + $0x18] sm:$0xff]   ;;  %v1328_v46 = vld [vmem:[%s1926_s3 + $0x28] sm:$0xff]  }
  0xdf   :  { %v277_v43 = vpop.f32.mrf.mxu0 }
  0xe0   :  { %v318_v6 = vmax.f32 %v286_v62, 0.0  ;;  %v278_v7 = vadd.f32 %v277_v43, %v106_v52  ;;  %v1325_v43 = vld [vmem:[%s1926_s3 + $0x48] sm:$0xff]   ;;  %v399_v52 = vpop.permute.xlu0 %398 }
  0xe1   :  { %v1236_v45 = vpop.f32.mrf.mxu0 }
  0xe2   :  { %v289_v57 = vadd.f32 %v1236_v45, %v121_v44  ;;  %v316_v14 = vmax.f32 %v278_v7, 0.0  ;;  %v1326_v44 = vld [vmem:[%s1926_s3 + $0x20] sm:$0xff]   ;;  %v1327_v45 = vld [vmem:[%s1926_s3 + $0x50] sm:$0xff]  }
  0xe3   :  { %v280_v47 = vpop.f32.mrf.mxu0 }
  0xe4   :  { %v319_v3 = vmax.f32 %v289_v57, 0.0  ;;  %v281_v4 = vadd.f32 %v280_v47, %v111_v49  ;;  %v1329_v47 = vld [vmem:[%s1926_s3 + $0x58] sm:$0xff]   ;;  %v1331_v49 = vld [vmem:[%s1926_s3 + $0x68] sm:$0xff]  }
  0xe5   :  { %v1239_v48 = vpop.f32.mrf.mxu0 }
  0xe6   :  { %v302_v51 = vadd.f32 %v1239_v48, %v136_v36  ;;  %v361_v10 = vpack.c.bf16 %v319_v3, %v318_v6  ;;  %v317_v11 = vmax.f32 %v281_v4, 0.0  ;;  %v310_v36 = vmax.f32 %v254_v25, 0.0  ;;  %v1330_v48 = vld [vmem:[%s1926_s3 + $0x60] sm:$0xff]  }
  0xe7   :  { %v293_v50 = vpop.f32.mrf.mxu0 }
  0xe8   :  { %v294_v54 = vadd.f32 %v293_v50, %v126_v34  ;;  %v322_v58 = vmax.f32 %v302_v51, 0.0  ;;  %v360_v17 = vpack.c.bf16 %v317_v11, %v316_v14  ;;  %v358_v34 = vpack.c.bf16 %v313_v24, %v312_v26  ;;  %v1332_v50 = vld [vmem:[%s1926_s3 + $0x70] sm:$0xff]   ;;  %v1333_v51 = vld [vmem:[%s1926_s3 + $0x78] sm:$0xff]  }
  0xe9   :  { %v1240_v53 = vpop.f32.mrf.mxu0  ;;  %v357_v37 = vpack.c.bf16 %v311_v28, %v310_v36 }
  0xea   :  { %v305_v55 = vadd.f32 %v1240_v53, %v141_v41  ;;  %v320_v63 = vmax.f32 %v294_v54, 0.0  ;;  %v1323_v41 = vld [vmem:[%s1926_s3 + $0x40] sm:$0xff]   ;;  %v404_v53 = vpop.permute.xlu1 %403  ;;  %v409_v54 = vpop.permute.xlu0 %408 }
  0xeb   :  { %v296_v56 = vpop.f32.mrf.mxu0 }
  0xec   :  { %v323_v59 = vmax.f32 %v305_v55, 0.0  ;;  %v297_v60 = vadd.f32 %v296_v56, %v131_v39  ;;  %v356_v39 = vpack.c.bf16 %v309_v38, %v308_v30 }
  0xee   :  { %v363_v0 = vpack.c.bf16 %v323_v59, %v322_v58  ;;  %v321_v1 = vmax.f32 %v297_v60, 0.0  ;;  %v414_v55 = vpop.permute.xlu1 %413  ;;  %v419_v56 = vpop.permute.xlu0 %418 }
  0xf0   :  { %v362_v5 = vpack.c.bf16 %v321_v1, %v320_v63  ;;  %1241 = vmatprep.subr.bf16.mxu0 %v363_v0  ;;  %1289 = vmatprep.subr.bf16.mxu1 %v363_v0 }
  0xf1   :  { %1242 = vmatpush3.bf16.msra.mxu0 %v363_v0  ;;  %1297 = vmatpush3.bf16.msra.mxu1 %v363_v0 }
  0xf2   :  { %1243 = vmatprep.subr.bf16.mxu0 %v362_v5  ;;  %1290 = vmatprep.subr.bf16.mxu1 %v362_v5  ;;  %v1735_v57 = vpop.permute.xlu1 %423  ;;  %v429_v58 = vpop.permute.xlu0 %428 }
  0xf5   :  { %1244 = vmatpush3.bf16.msra.mxu0 %v362_v5  ;;  %1298 = vmatpush3.bf16.msra.mxu1 %v362_v5 }
  0xf6   :  { %1245 = vmatprep.subr.bf16.mxu0 %v361_v10  ;;  %1291 = vmatprep.subr.bf16.mxu1 %v361_v10  ;;  %v1737_v59 = vpop.permute.xlu1 %433  ;;  %v1739_v60 = vpop.permute.xlu0 %438 }
  0xf9   :  { %1246 = vmatpush3.bf16.msra.mxu0 %v361_v10  ;;  %1299 = vmatpush3.bf16.msra.mxu1 %v361_v10 }
  0xfa   :  { %1247 = vmatprep.subr.bf16.mxu0 %v360_v17  ;;  %1292 = vmatprep.subr.bf16.mxu1 %v360_v17  ;;  %v1741_v61 = vpop.permute.xlu1 %443  ;;  %v1743_v62 = vpop.permute.xlu0 %448 }
  0xfd   :  { %1248 = vmatpush3.bf16.msra.mxu0 %v360_v17  ;;  %1300 = vmatpush3.bf16.msra.mxu1 %v360_v17 }
  0xfe   :  { %1249 = vmatprep.subr.bf16.mxu0 %v359_v23  ;;  %1293 = vmatprep.subr.bf16.mxu1 %v359_v23  ;;  %v1745_v63 = vpop.permute.xlu1 %453  ;;  %v1747_v0 = vpop.permute.xlu0 %458 }
 0x101   :  { %1250 = vmatpush3.bf16.msra.mxu0 %v359_v23  ;;  %1301 = vmatpush3.bf16.msra.mxu1 %v359_v23 }
 0x102   :  { %1251 = vmatprep.subr.bf16.mxu0 %v358_v34  ;;  %1294 = vmatprep.subr.bf16.mxu1 %v358_v34  ;;  %v1749_v1 = vpop.permute.xlu1 %463  ;;  %v1751_v2 = vpop.permute.xlu0 %468 }
 0x105   :  { %1252 = vmatpush3.bf16.msra.mxu0 %v358_v34  ;;  %1302 = vmatpush3.bf16.msra.mxu1 %v358_v34 }
 0x106   :  { %1253 = vmatprep.subr.bf16.mxu0 %v357_v37  ;;  %1295 = vmatprep.subr.bf16.mxu1 %v357_v37  ;;  %v1753_v3 = vpop.permute.xlu1 %473  ;;  %v1755_v4 = vpop.permute.xlu0 %478 }
 0x109   :  { %1254 = vmatpush3.bf16.msra.mxu0 %v357_v37  ;;  %1303 = vmatpush3.bf16.msra.mxu1 %v357_v37 }
 0x10a   :  { %1255 = vmatprep.subr.bf16.mxu0 %v356_v39  ;;  %1296 = vmatprep.subr.bf16.mxu1 %v356_v39  ;;  %v1757_v5 = vpop.permute.xlu1 %483  ;;  %v1759_v6 = vpop.permute.xlu0 %488 }
 0x10d   :  { %1256 = vmatpush3.bf16.msra.mxu0 %v356_v39  ;;  %1304 = vmatpush3.bf16.msra.mxu1 %v356_v39 }
 0x10e   :  { %v1761_v7 = vpop.permute.xlu1 %493  ;;  %v1763_v8 = vpop.permute.xlu0 %498 }
 0x110   :  { %1258 = vmatmul.mubr.bf16.vlgmr.msra.gmra.mxu0 %v1320_v33  ;;  %1270 = vmatmul.mubr.bf16.vlgmr.msra.gmra.mxu1 %v1321_v31 }
 0x111   :  { %1261 = vmatprep.mubr.bf16.mxu0 %v1322_v40  ;;  %1273 = vmatprep.mubr.bf16.mxu1 %v1323_v41 }
 0x112   :  { %v1765_v9 = vpop.permute.xlu1 %503  ;;  %v1767_v10 = vpop.permute.xlu0 %508 }
 0x116   :  { %v1769_v11 = vpop.permute.xlu1 %513  ;;  %v1771_v12 = vpop.permute.xlu0 %518 }
 0x118   :  { %1262 = vmatmul.mubr.bf16.gmra.mxu0 %v1324_v42  ;;  %1274 = vmatmul.mubr.bf16.gmra.mxu1 %v1325_v43 }
 0x119   :  { %1265 = vmatprep.mubr.bf16.mxu0 %v1326_v44  ;;  %1277 = vmatprep.mubr.bf16.mxu1 %v1327_v45 }
 0x11a   :  { %v1773_v13 = vpop.permute.xlu1 %523  ;;  %v1775_v14 = vpop.permute.xlu0 %528 }
 0x11e   :  { %v1777_v15 = vpop.permute.xlu1 %533  ;;  %v1779_v16 = vpop.permute.xlu0 %538 }
 0x11f   :  { %1931 = vst [vmem:[#allocation6_spill] sm:$0xff] %v1779_v16 }
 0x120   :  { %1266 = vmatmul.mubr.bf16.gmra.mxu0 %v1328_v46  ;;  %1278 = vmatmul.mubr.bf16.gmra.mxu1 %v1329_v47 }
 0x121   :  { %1281 = vmatprep.mubr.bf16.mxu1 %v1330_v48 }
 0x122   :  { %v880_v17 = vpop.permute.xlu1 %879  ;;  %v885_v18 = vpop.permute.xlu0 %884 }
 0x126   :  { %v890_v19 = vpop.permute.xlu1 %889  ;;  %v895_v20 = vpop.permute.xlu0 %894 }
 0x128   :  { %1282 = vmatmul.mubr.bf16.gmra.mxu1 %v1331_v49 }
 0x129   :  { %1285 = vmatprep.mubr.bf16.mxu1 %v1332_v50 }
 0x12a   :  { %v900_v21 = vpop.permute.xlu1 %899  ;;  %v1781_v22 = vpop.permute.xlu0 %904 }
 0x12e   :  { %v910_v23 = vpop.permute.xlu1 %909  ;;  %v1783_v24 = vpop.permute.xlu0 %914 }
 0x130   :  { %1286 = vmatmul.mubr.bf16.gmra.mxu1 %v1333_v51 }
 0x132   :  { %v1785_v25 = vpop.permute.xlu1 %919  ;;  %v1787_v26 = vpop.permute.xlu0 %924 }
 0x136   :  { %v1789_v27 = vpop.permute.xlu1 %929  ;;  %v1793_v34 = vpop.permute.xlu0 %934 }
 0x13a   :  { %v1797_v32 = vpop.permute.xlu1 %939  ;;  %v1803_v42 = vpop.permute.xlu0 %944 }
 0x13e   :  { %v1807_v47 = vpop.permute.xlu1 %949 }
 0x1d0   :  { %v1259_v28 = vpop.f32.mrf.mxu0  ;;  %v1791_v29 = vpop.f32.mrf.mxu1 }
 0x1d1   :  { %v695_v38 = vadd.f32 %v1259_v28, %v409_v54 }
 0x1d2   :  { %v686_v35 = vpop.f32.mrf.mxu0  ;;  %v1795_v36 = vpop.f32.mrf.mxu1 }
 0x1d3   :  { %v687_v37 = vadd.f32 %v686_v35, %v399_v52  ;;  %v815_v43 = vmax.f32 %v695_v38, 0.0  ;;  %v1813_v38 = vpop.permute.xlu0 %954 }
 0x1d4   :  { %v1260_v30 = vpop.f32.mrf.mxu0  ;;  %v1799_v39 = vpop.f32.mrf.mxu1 }
 0x1d5   :  { %v813_v33 = vmax.f32 %v687_v37, 0.0  ;;  %v698_v31 = vadd.f32 %v1260_v30, %v414_v55  ;;  %v1039_v55 = vmul.f32 %v890_v19, %v815_v43 }
 0x1d6   :  { %v689_v40 = vpop.f32.mrf.mxu0  ;;  %v1801_v41 = vpop.f32.mrf.mxu1 }
 0x1d7   :  { %v690_v44 = vadd.f32 %v689_v40, %v404_v53  ;;  %v1037_v48 = vmul.f32 %v880_v17, %v813_v33  ;;  %v816_v49 = vmax.f32 %v698_v31, 0.0 }
 0x1d8   :  { %v1263_v45 = vpop.f32.mrf.mxu0  ;;  %v1805_v46 = vpop.f32.mrf.mxu1 }
 0x1d9   :  { %v814_v50 = vmax.f32 %v690_v44, 0.0  ;;  %v711_v35 = vadd.f32 %v1263_v45, %v429_v58  ;;  %v1070_v40 = vsel %vm1069_vm1, %v1037_v48, 0.0  ;;  %v1040_v16 = vmul.f32 %v895_v20, %v816_v49 }
 0x1da   :  { %v702_v51 = vpop.f32.mrf.mxu0  ;;  %v1809_v52 = vpop.f32.mrf.mxu1 }
 0x1db   :  { %v703_v54 = vadd.f32 %v702_v51, %v419_v56  ;;  %v1038_v28 = vmul.f32 %v885_v18, %v814_v50  ;;  %v1820_v56 = vpop.permute.xlu1 %959  ;;  %v1073_v18 = vsel %vm1069_vm1, %v1039_v55, 0.0  ;;  %v819_v19 = vmax.f32 %v711_v35, 0.0 }
 0x1dc   :  { %v1264_v37 = vpop.f32.mrf.mxu0  ;;  %v1811_v30 = vpop.f32.mrf.mxu1  ;;  %v1075_v48 = vsel %vm1069_vm1, %v1040_v16, 0.0 }
 0x1dd   :  { %v817_v53 = vmax.f32 %v703_v54, 0.0  ;;  %v1071_v17 = vsel %vm1069_vm1, %v1038_v28, 0.0  ;;  %v714_v33 = vadd.f32 %v1264_v37, %v1737_v59  ;;  %v1829_v37 = vpop.permute.xlu0 %964 }
 0x1de   :  { %v705_v31 = vpop.f32.mrf.mxu0  ;;  %v1818_v44 = vpop.f32.mrf.mxu1  ;;  %v1072_v58 = vadd.f32 %v1071_v17, %v1070_v40  ;;  %v1043_v17 = vmul.f32 %v910_v23, %v819_v19 }
 0x1df   :  { %v1041_v43 = vmul.f32 %v900_v21, %v817_v53  ;;  %v706_v45 = vadd.f32 %v705_v31, %v1735_v57  ;;  %v820_v49 = vmax.f32 %v714_v33, 0.0  ;;  %v1837_v33 = vpop.permute.xlu1 %969 }
 0x1e0   :  { %v1267_v50 = vpop.f32.mrf.mxu0  ;;  %v1824_v51 = vpop.f32.mrf.mxu1  ;;  %v1074_v20 = vadd.f32 %v1073_v18, %v1072_v58 }
 0x1e1   :  { %v818_v59 = vmax.f32 %v706_v45, 0.0  ;;  %v1077_v55 = vsel %vm1069_vm1, %v1041_v43, 0.0  ;;  %v727_v16 = vadd.f32 %v1267_v50, %v1743_v62  ;;  %v1044_v58 = vmul.f32 %v1783_v24, %v820_v49  ;;  %v1847_v24 = vpop.permute.xlu0 %974 }
 0x1e2   :  { %v718_v54 = vpop.f32.mrf.mxu0  ;;  %v1827_v28 = vpop.f32.mrf.mxu1  ;;  %v1076_v40 = vadd.f32 %v1075_v48, %v1074_v20  ;;  %v735_v48 = vadd.f32 %v1795_v36, %v1747_v0 }
 0x1e3   :  { %v1042_v21 = vmul.f32 %v1781_v22, %v818_v59  ;;  %v719_v57 = vadd.f32 %v718_v54, %v1739_v60  ;;  %v1081_v22 = vsel %vm1069_vm1, %v1043_v17, 0.0  ;;  %v823_v50 = vmax.f32 %v727_v16, 0.0 }
 0x1e4   :  { %v1268_v35 = vpop.f32.mrf.mxu0  ;;  %v1834_v53 = vpop.f32.mrf.mxu1  ;;  %v1078_v31 = vadd.f32 %v1077_v55, %v1076_v40  ;;  %v1083_v49 = vsel %vm1069_vm1, %v1044_v58, 0.0  ;;  %v738_v54 = vadd.f32 %v1801_v41, %v1749_v1  ;;  %v746_v1 = vadd.f32 %v1799_v39, %v1753_v3 }
 0x1e5   :  { %v1079_v18 = vsel %vm1069_vm1, %v1042_v21, 0.0  ;;  %v821_v45 = vmax.f32 %v719_v57, 0.0  ;;  %v730_v43 = vadd.f32 %v1268_v35, %v1745_v63  ;;  %v1852_v55 = vpop.permute.xlu1 %979  ;;  %v1047_v21 = vmul.f32 %v1789_v27, %v823_v50  ;;  %v985_v58 = vpop.permute.xlu0 %984 }
 0x1e6   :  { %v721_v23 = vpop.f32.mrf.mxu0  ;;  %v1080_v19 = vadd.f32 %v1079_v18, %v1078_v31  ;;  %v769_v20 = vpop.f32.mrf.mxu1  ;;  %v826_v41 = vmax.f32 %v738_v54, 0.0  ;;  %v751_v27 = vadd.f32 %v1809_v52, %v1755_v4  ;;  %v759_v4 = vadd.f32 %v1805_v46, %v1759_v6 }
 0x1e7   :  { %v1045_v60 = vmul.f32 %v1785_v25, %v821_v45  ;;  %v722_v59 = vadd.f32 %v721_v23, %v1741_v61  ;;  %v824_v40 = vmax.f32 %v730_v43, 0.0  ;;  %v743_v25 = vadd.f32 %v1791_v29, %v1751_v2 }
 0x1e8   :  { %v1082_v62 = vadd.f32 %v1081_v22, %v1080_v19  ;;  %v1857_v36 = vpop.f32.mrf.mxu1  ;;  %v825_v61 = vmax.f32 %v735_v48, 0.0  ;;  %v1089_v23 = vsel %vm1069_vm1, %v1047_v21, 0.0  ;;  %v828_v43 = vmax.f32 %v746_v1, 0.0 }
 0x1e9   :  { %v822_v17 = vmax.f32 %v722_v59, 0.0  ;;  %v1085_v0 = vsel %vm1069_vm1, %v1045_v60, 0.0  ;;  %v1048_v31 = vmul.f32 %v1793_v34, %v824_v40  ;;  %v827_v18 = vmax.f32 %v743_v25, 0.0 }
 0x1ea   :  { %v1084_v63 = vadd.f32 %v1083_v49, %v1082_v62  ;;  %v782_v29 = vpop.f32.mrf.mxu1  ;;  %v1049_v45 = vmul.f32 %v1797_v32, %v825_v61  ;;  %v1050_v3 = vmul.f32 %v1803_v42, %v826_v41  ;;  %v754_v34 = vadd.f32 %v1818_v44, %v1757_v5  ;;  %v995_v62 = vpop.permute.xlu0 %994 }
 0x1eb   :  { %v1046_v35 = vmul.f32 %v1787_v26, %v822_v17  ;;  %v990_v26 = vpop.permute.xlu1 %989  ;;  %v1091_v39 = vsel %vm1069_vm1, %v1048_v31, 0.0  ;;  %v1051_v48 = vmul.f32 %v1807_v47, %v827_v18  ;;  %v829_v52 = vmax.f32 %v751_v27, 0.0 }
 0x1ec   :  { %v1086_v57 = vadd.f32 %v1085_v0, %v1084_v63  ;;  %v1284_v60 = vpop.f32.mrf.mxu1  ;;  %v1093_v32 = vsel %vm1069_vm1, %v1049_v45, 0.0  ;;  %v1052_v59 = vmul.f32 %v1813_v38, %v828_v43  ;;  %v1095_v42 = vsel %vm1069_vm1, %v1050_v3, 0.0 }
 0x1ed   :  { %v1087_v16 = vsel %vm1069_vm1, %v1046_v35, 0.0  ;;  %v762_v5 = vadd.f32 %v1811_v30, %v1761_v7  ;;  %v830_v44 = vmax.f32 %v754_v34, 0.0  ;;  %v1097_v47 = vsel %vm1069_vm1, %v1051_v48, 0.0 }
 0x1ee   :  { %v1088_v2 = vadd.f32 %v1087_v16, %v1086_v57  ;;  %v785_v63 = vpop.f32.mrf.mxu1  ;;  %v831_v40 = vmax.f32 %v759_v4, 0.0  ;;  %v1053_v17 = vmul.f32 %v1820_v56, %v829_v52  ;;  %v767_v6 = vadd.f32 %v1827_v28, %v1763_v8  ;;  %v1005_v30 = vpop.permute.xlu0 %1004 }
 0x1ef   :  { %v1000_v49 = vpop.permute.xlu1 %999  ;;  %v1099_v38 = vsel %vm1069_vm1, %v1052_v59, 0.0  ;;  %v832_v25 = vmax.f32 %v762_v5, 0.0  ;;  %v1054_v0 = vmul.f32 %v1829_v37, %v830_v44  ;;  %v770_v7 = vadd.f32 %v769_v20, %v1765_v9  ;;  %v1932_v59 = vld [vmem:[#allocation6_spill] sm:$0xff] }
 0x1f0   :  { %v1090_v19 = vadd.f32 %v1089_v23, %v1088_v2  ;;  %v1287_v21 = vpop.f32.mrf.mxu1  ;;  %v1055_v57 = vmul.f32 %v1837_v33, %v831_v40  ;;  %v1101_v35 = vsel %vm1069_vm1, %v1053_v17, 0.0  ;;  %v775_v56 = vadd.f32 %v1824_v51, %v1767_v10 }
 0x1f1   :  { %v833_v1 = vmax.f32 %v767_v6, 0.0  ;;  %v1056_v41 = vmul.f32 %v1847_v24, %v832_v25  ;;  %v1103_v31 = vsel %vm1069_vm1, %v1054_v0, 0.0  ;;  %v778_v9 = vadd.f32 %v1834_v53, %v1769_v11 }
 0x1f2   :  { %v1092_v22 = vadd.f32 %v1091_v39, %v1090_v19  ;;  %v834_v37 = vmax.f32 %v770_v7, 0.0  ;;  %v798_v16 = vpop.f32.mrf.mxu1  ;;  %v1105_v33 = vsel %vm1069_vm1, %v1055_v57, 0.0  ;;  %v835_v2 = vmax.f32 %v775_v56, 0.0  ;;  %v544_v51 = vpop.permute.xlu0 %543 }
 0x1f3   :  { %v1010_v8 = vpop.permute.xlu1 %1009  ;;  %v1057_v18 = vmul.f32 %v1852_v55, %v833_v1  ;;  %v783_v10 = vadd.f32 %v782_v29, %v1771_v12  ;;  %v1107_v27 = vsel %vm1069_vm1, %v1056_v41, 0.0  ;;  %v836_v24 = vmax.f32 %v778_v9, 0.0 }
 0x1f4   :  { %v1094_v50 = vadd.f32 %v1093_v32, %v1092_v22  ;;  %v1058_v23 = vmul.f32 %v985_v58, %v834_v37  ;;  %v786_v19 = vadd.f32 %v785_v63, %v1773_v13  ;;  %v1288_v53 = vpop.f32.mrf.mxu1  ;;  %v1059_v3 = vmul.f32 %v990_v26, %v835_v2 }
 0x1f5   :  { %v1109_v34 = vsel %vm1069_vm1, %v1057_v18, 0.0  ;;  %v791_v39 = vadd.f32 %v1857_v36, %v1775_v14  ;;  %v837_v55 = vmax.f32 %v783_v10, 0.0  ;;  %v1060_v12 = vmul.f32 %v995_v62, %v836_v24 }
 0x1f6   :  { %v1096_v54 = vadd.f32 %v1095_v42, %v1094_v50  ;;  %v1111_v29 = vsel %vm1069_vm1, %v1058_v23, 0.0  ;;  %v794_v48 = vadd.f32 %v1284_v60, %v1777_v15  ;;  %v838_v32 = vmax.f32 %v786_v19, 0.0  ;;  %v549_v58 = vpop.permute.xlu0 %548  ;;  %v801_v13 = vpop.f32.mrf.mxu1 }
 0x1f7   :  { %v1015_v43 = vpop.permute.xlu1 %1014  ;;  %v1113_v52 = vsel %vm1069_vm1, %v1059_v3, 0.0  ;;  %v839_v50 = vmax.f32 %v791_v39, 0.0  ;;  %v1061_v26 = vmul.f32 %v1000_v49, %v837_v55  ;;  %v799_v42 = vadd.f32 %v798_v16, %v1932_v59 }
 0x1f8   :  { %v1098_v46 = vadd.f32 %v1097_v47, %v1096_v54  ;;  %v1115_v14 = vsel %vm1069_vm1, %v1060_v12, 0.0  ;;  %v840_v36 = vmax.f32 %v794_v48, 0.0  ;;  %v1062_v62 = vmul.f32 %v1005_v30, %v838_v32 }
 0x1f9   :  { %v802_v54 = vadd.f32 %v801_v13, %v544_v51  ;;  %v1063_v47 = vmul.f32 %v1010_v8, %v839_v50  ;;  %v1117_v15 = vsel %vm1069_vm1, %v1061_v26, 0.0  ;;  %v807_v60 = vadd.f32 %v1287_v21, %v549_v58 }
 0x1fa   :  { %v1100_v61 = vadd.f32 %v1099_v38, %v1098_v46  ;;  %v841_v40 = vmax.f32 %v799_v42, 0.0  ;;  %v554_v17 = vpop.permute.xlu0 %553  ;;  %v1064_v46 = vmul.f32 %v1015_v43, %v840_v36  ;;  %v1119_v49 = vsel %vm1069_vm1, %v1062_v62, 0.0 }
 0x1fb   :  { %v1020_v5 = vpop.permute.xlu1 %1019  ;;  %v810_v38 = vadd.f32 %v1288_v53, %v554_v17  ;;  %v842_v25 = vmax.f32 %v802_v54, 0.0  ;;  %v843_v57 = vmax.f32 %v807_v60, 0.0  ;;  %v1140_v43 = vstv %s1929_s6 }
 0x1fc   :  { %v1102_v28 = vadd.f32 %v1101_v35, %v1100_v61  ;;  %v1121_v61 = vsel %vm1069_vm1, %v1063_v47, 0.0  ;;  %v1065_v30 = vmul.f32 %v1020_v5, %v841_v40  ;;  %v1123_v56 = vsel %vm1069_vm1, %v1064_v46, 0.0 }
 0x1fd   :  { %v844_v1 = vmax.f32 %v810_v38, 0.0 }
 0x1fe   :  { %v1104_v20 = vadd.f32 %v1103_v31, %v1102_v28  ;;  %v1030_v21 = vpop.permute.xlu0 %1029  ;;  %v1125_v31 = vsel %vm1069_vm1, %v1065_v30, 0.0 }
 0x1ff   :  { %v1025_v0 = vpop.permute.xlu1 %1024  ;;  %v1067_v41 = vmul.f32 %v1030_v21, %v843_v57 }
 0x200   :  { %v1106_v45 = vadd.f32 %v1105_v33, %v1104_v20  ;;  %v1066_v8 = vmul.f32 %v1025_v0, %v842_v25 }
 0x201   :  { %v1129_v2 = vsel %vm1069_vm1, %v1067_v41, 0.0 }
 0x202   :  { %v1108_v11 = vadd.f32 %v1107_v27, %v1106_v45  ;;  %v1127_v16 = vsel %vm1069_vm1, %v1066_v8, 0.0 }
 0x203   :  { %v1035_v9 = vpop.permute.xlu1 %1034 }
 0x204   :  { %v1110_v22 = vadd.f32 %v1109_v34, %v1108_v11  ;;  %v1068_v20 = vmul.f32 %v1035_v9, %v844_v1 }
 0x206   :  { %v1112_v4 = vadd.f32 %v1111_v29, %v1110_v22  ;;  %v1131_v10 = vsel %vm1069_vm1, %v1068_v20, 0.0 }
 0x208   :  { %v1114_v44 = vadd.f32 %v1113_v52, %v1112_v4 }
 0x20a   :  { %v1116_v63 = vadd.f32 %v1115_v14, %v1114_v44 }
 0x20c   :  { %v1118_v6 = vadd.f32 %v1117_v15, %v1116_v63 }
 0x20e   :  { %v1120_v7 = vadd.f32 %v1119_v49, %v1118_v6 }
 0x210   :  { %v1122_v35 = vadd.f32 %v1121_v61, %v1120_v7 }
 0x212   :  { %v1124_v28 = vadd.f32 %v1123_v56, %v1122_v35 }
 0x214   :  { %v1126_v37 = vadd.f32 %v1125_v31, %v1124_v28 }
 0x216   :  { %v1128_v33 = vadd.f32 %v1127_v16, %v1126_v37 }
 0x218   :  { %v1130_v18 = vadd.f32 %v1129_v2, %v1128_v33 }
 0x21a   :  { %v1132_v51 = vadd.f32 %v1131_v10, %v1130_v18 }
 0x21c   :  { %v1133_v45 = vrot.slane %v1132_v51, 4 }
 0x21e   :  { %v1134_v27 = vadd.f32 %v1133_v45, %v1132_v51 }
 0x220   :  { %v1135_v24 = vrot.slane %v1134_v27, 2 }
 0x222   :  { %v1136_v23 = vadd.f32 %v1135_v24, %v1134_v27 }
 0x224   :  { %v1137_v19 = vrot.slane %v1136_v23, 1 }
 0x226   :  { %v1138_v11 = vadd.f32 %v1137_v19, %v1136_v23 }
 0x228   :  { %v1141_v53 = vadd.f32 %v1140_v43, %v1138_v11 }
 0x22a   :  { %1143 = vst.msk [vmem:[#allocation3] sm:$0x1] %vm1142_vm2, %v1141_v53 }
 0x22b   :  { %1345 = shalt.err (!%p1342_p4)
}
 0x22c   :  { %1153 = dma.vmem_to_hbm [thread:$0]  %s1151_s28, 16, %s1930_s7, [#allocation4]  }
 0x22d   :  { %1354 = dma.done.wait [#allocation4], 16  }
 0x22e   :  { %1355 = vsyncadd [#allocation4], 4294967280 }
 0x22f   :  { %1157 = vsyncpa [#allocation4], 1 }

// kernel: tpu_custom_call.1
= control target key start
LH: loop header
LB: loop body
LE: loop exit
PB: predicated region body
PF: predicated region fallthrough
CT: control target
= control target key end

     0   :  { %vm183_vm0 = vcmask 261120   ;;  %v1356_v3 = vmov 0   ;;  %s1923_s0 = inlined_call_operand.vmem [shape: f32[8,32], index: 0, kind: input, shape index: {}]   ;;  %s1924_s1 = inlined_call_operand.vmem [shape: bf16[128,32], index: 1, kind: input, shape index: {}]   ;;  %s1925_s2 = inlined_call_operand.vmem [shape: f32[128,1], index: 2, kind: input, shape index: {}]   ;;  %s1926_s3 = inlined_call_operand.vmem [shape: bf16[256,128], index: 3, kind: input, shape index: {}]   ;;  %s1927_s4 = inlined_call_operand.vmem [shape: f32[256,1], index: 4, kind: input, shape index: {}]   ;;  %s1928_s5 = inlined_call_operand.vmem [shape: f32[256,1], index: 5, kind: input, shape index: {}]   ;;  %s1929_s6 = inlined_call_operand.<no memory space> [shape: f32[1], index: 6, kind: input, shape index: {}]   ;;  %s1930_s7 = inlined_call_operand.hbm [shape: f32[1,1,8], index: 7, kind: output, shape index: {}]  }
   0x1   :  { %v61_v0 = vld [vmem:[%s1925_s2 + $0x70] sm:$0xff]  ;;  %v59_v1 = vld [vmem:[%s1925_s2 + $0x60] sm:$0xff]  ;;  %1309 = vset.pattern.permute.xlu1 %v1356_v3  ;;  %1308 = vset.pattern.permute.xlu0 %v1356_v3  ;;  %v62_v5 = vld [vmem:[%s1925_s2 + $0x78] sm:$0xff] }
   0x2   :  { %v29_v2 = vld [vmem:[%s1923_s0] sm:$0xff]  ;;  %135 = vperm.xlu0 %1308, %v61_v0   ;;  %125 = vperm.xlu1 %1309, %v59_v1   ;;  %v60_v6 = vld [vmem:[%s1925_s2 + $0x68] sm:$0xff]  ;;  %v58_v9 = vld [vmem:[%s1925_s2 + $0x58] sm:$0xff] }
   0x3   :  { %v30_v4 = vpack.c.bf16 %v29_v2, %v29_v2  ;;  %v1310_v8 = vld [vmem:[%s1924_s1] sm:$0xff]   ;;  %v57_v10 = vld [vmem:[%s1925_s2 + $0x50] sm:$0xff]  ;;  %v1311_v11 = vld [vmem:[%s1924_s1 + $0x8] sm:$0xff]  }
   0x4   :  { %1225 = vmatprep.mubr.msk.bf16.mxu0 %vm183_vm0, %v1310_v8  ;;  %v1312_v12 = vld [vmem:[%s1924_s1 + $0x10] sm:$0xff]   ;;  %v56_v13 = vld [vmem:[%s1925_s2 + $0x48] sm:$0xff]  ;;  %v55_v14 = vld [vmem:[%s1925_s2 + $0x40] sm:$0xff] }
   0x5   :  { %1305 = vmatprep.subr.msk.bf16.mxu0 %vm183_vm0, %v30_v4  ;;  %v209_v7 = vsel %vm183_vm0, %v30_v4, 0  ;;  %v54_v15 = vld [vmem:[%s1925_s2 + $0x38] sm:$0xff]  ;;  %v53_v16 = vld [vmem:[%s1925_s2 + $0x30] sm:$0xff]  ;;  %v1314_v18 = vld [vmem:[%s1924_s1 + $0x20] sm:$0xff]  }
   0x6   :  { %1224 = vmatpush3.bf16.xpose.msra.mxu0 %v209_v7  ;;  %140 = vperm.xlu0 %1308, %v62_v5   ;;  %v1313_v17 = vld [vmem:[%s1924_s1 + $0x18] sm:$0xff]   ;;  %v52_v19 = vld [vmem:[%s1925_s2 + $0x28] sm:$0xff]  ;;  %v51_v20 = vld [vmem:[%s1925_s2 + $0x20] sm:$0xff] }
   0x7   :  { %130 = vperm.xlu1 %1309, %v60_v6   ;;  %v50_v21 = vld [vmem:[%s1925_s2 + $0x18] sm:$0xff]  ;;  %v49_v22 = vld [vmem:[%s1925_s2 + $0x10] sm:$0xff]  ;;  %v1315_v23 = vld [vmem:[%s1924_s1 + $0x28] sm:$0xff]  }
   0x8   :  { %v1316_v24 = vld [vmem:[%s1924_s1 + $0x30] sm:$0xff]   ;;  %v48_v25 = vld [vmem:[%s1925_s2 + $0x8] sm:$0xff]  ;;  %v47_v26 = vld [vmem:[%s1925_s2] sm:$0xff] }
   0x9   :  { %v365_v27 = vld [vmem:[%s1927_s4 + $0x8] sm:$0xff]  ;;  %v364_v28 = vld [vmem:[%s1927_s4] sm:$0xff]  ;;  %v1317_v29 = vld [vmem:[%s1924_s1 + $0x38] sm:$0xff]  }
   0xa   :  { %115 = vperm.xlu0 %1308, %v57_v10   ;;  %v367_v30 = vld [vmem:[%s1927_s4 + $0x18] sm:$0xff]  ;;  %v366_v31 = vld [vmem:[%s1927_s4 + $0x10] sm:$0xff]  ;;  %v369_v32 = vld [vmem:[%s1927_s4 + $0x28] sm:$0xff] }
   0xb   :  { %120 = vperm.xlu1 %1309, %v58_v9   ;;  %v368_v33 = vld [vmem:[%s1927_s4 + $0x20] sm:$0xff]  ;;  %v371_v34 = vld [vmem:[%s1927_s4 + $0x38] sm:$0xff]  ;;  %v370_v35 = vld [vmem:[%s1927_s4 + $0x30] sm:$0xff] }
   0xd   :  { %1226 = vmatmul.mubr.msk.bf16.vlgmr.msra.gmra.mxu0 %vm183_vm0, %v1311_v11 }
   0xe   :  { %1229 = vmatprep.mubr.msk.bf16.mxu0 %vm183_vm0, %v1312_v12  ;;  %105 = vperm.xlu0 %1308, %v55_v14  }
   0xf   :  { %110 = vperm.xlu1 %1309, %v56_v13  }
  0x12   :  { %95 = vperm.xlu0 %1308, %v53_v16  }
  0x13   :  { %100 = vperm.xlu1 %1309, %v54_v15  }
  0x15   :  { %1230 = vmatmul.mubr.msk.bf16.gmra.mxu0 %vm183_vm0, %v1313_v17 }
  0x16   :  { %1233 = vmatprep.mubr.msk.bf16.mxu0 %vm183_vm0, %v1314_v18  ;;  %85 = vperm.xlu0 %1308, %v51_v20  }
  0x17   :  { %90 = vperm.xlu1 %1309, %v52_v19  }
  0x1a   :  { %75 = vperm.xlu0 %1308, %v49_v22  }
  0x1b   :  { %80 = vperm.xlu1 %1309, %v50_v21  }
  0x1d   :  { %1234 = vmatmul.mubr.msk.bf16.gmra.mxu0 %vm183_vm0, %v1315_v23 }
  0x1e   :  { %1237 = vmatprep.mubr.msk.bf16.mxu0 %vm183_vm0, %v1316_v24  ;;  %65 = vperm.xlu0 %1308, %v47_v26  }
  0x1f   :  { %70 = vperm.xlu1 %1309, %v48_v25  }
  0x22   :  { %398 = vperm.xlu0 %1308, %v364_v28  }
  0x23   :  { %403 = vperm.xlu1 %1309, %v365_v27  }
  0x25   :  { %1238 = vmatmul.mubr.msk.bf16.gmra.mxu0 %vm183_vm0, %v1317_v29 }
  0x26   :  { %408 = vperm.xlu0 %1308, %v366_v31  }
  0x27   :  { %413 = vperm.xlu1 %1309, %v367_v30  }
  0x2a   :  { %418 = vperm.xlu0 %1308, %v368_v33  }
  0x2b   :  { %423 = vperm.xlu1 %1309, %v369_v32  }
  0x2c   :  { %13 = vsyncpa [#allocation4], 0  ;;  %v373_v36 = vld [vmem:[%s1927_s4 + $0x48] sm:$0xff]  ;;  %v372_v37 = vld [vmem:[%s1927_s4 + $0x40] sm:$0xff]  ;;  %vm1069_vm1 = vcmask 64512   ;;  %vm1142_vm2 = vcmask 57344  }
  0x2d   :  { %v375_v38 = vld [vmem:[%s1927_s4 + $0x58] sm:$0xff]  ;;  %v374_v39 = vld [vmem:[%s1927_s4 + $0x50] sm:$0xff]  ;;  %v377_v40 = vld [vmem:[%s1927_s4 + $0x68] sm:$0xff] }
  0x2e   :  { %428 = vperm.xlu0 %1308, %v370_v35   ;;  %v376_v41 = vld [vmem:[%s1927_s4 + $0x60] sm:$0xff]  ;;  %v379_v42 = vld [vmem:[%s1927_s4 + $0x78] sm:$0xff]  ;;  %v378_v43 = vld [vmem:[%s1927_s4 + $0x70] sm:$0xff] }
  0x2f   :  { %433 = vperm.xlu1 %1309, %v371_v34   ;;  %v381_v44 = vld [vmem:[%s1927_s4 + $0x88] sm:$0xff]  ;;  %v380_v45 = vld [vmem:[%s1927_s4 + $0x80] sm:$0xff]  ;;  %v383_v46 = vld [vmem:[%s1927_s4 + $0x98] sm:$0xff] }
  0x30   :  { %v382_v47 = vld [vmem:[%s1927_s4 + $0x90] sm:$0xff]  ;;  %v385_v48 = vld [vmem:[%s1927_s4 + $0xa8] sm:$0xff]  ;;  %v384_v49 = vld [vmem:[%s1927_s4 + $0xa0] sm:$0xff] }
  0x31   :  { %v387_v50 = vld [vmem:[%s1927_s4 + $0xb8] sm:$0xff]  ;;  %v386_v51 = vld [vmem:[%s1927_s4 + $0xb0] sm:$0xff]  ;;  %v389_v52 = vld [vmem:[%s1927_s4 + $0xc8] sm:$0xff] }
  0x32   :  { %438 = vperm.xlu0 %1308, %v372_v37   ;;  %v388_v53 = vld [vmem:[%s1927_s4 + $0xc0] sm:$0xff]  ;;  %v391_v54 = vld [vmem:[%s1927_s4 + $0xd8] sm:$0xff]  ;;  %v390_v55 = vld [vmem:[%s1927_s4 + $0xd0] sm:$0xff] }
  0x33   :  { %443 = vperm.xlu1 %1309, %v373_v36   ;;  %v845_v56 = vld [vmem:[%s1928_s5] sm:$0xff]  ;;  %v847_v58 = vld [vmem:[%s1928_s5 + $0x10] sm:$0xff]  ;;  %v846_v59 = vld [vmem:[%s1928_s5 + $0x8] sm:$0xff] }
  0x34   :  { %v392_v57 = vld [vmem:[%s1927_s4 + $0xe0] sm:$0xff]  ;;  %v848_v61 = vld [vmem:[%s1928_s5 + $0x18] sm:$0xff]  ;;  %v851_v62 = vld [vmem:[%s1928_s5 + $0x30] sm:$0xff] }
  0x35   :  { %v849_v60 = vld [vmem:[%s1928_s5 + $0x20] sm:$0xff]  ;;  %v850_v63 = vld [vmem:[%s1928_s5 + $0x28] sm:$0xff]  ;;  %v852_v1 = vld [vmem:[%s1928_s5 + $0x38] sm:$0xff] }
  0x36   :  { %448 = vperm.xlu0 %1308, %v374_v39   ;;  %v853_v0 = vld [vmem:[%s1928_s5 + $0x40] sm:$0xff]  ;;  %v855_v2 = vld [vmem:[%s1928_s5 + $0x50] sm:$0xff]  ;;  %v854_v3 = vld [vmem:[%s1928_s5 + $0x48] sm:$0xff] }
  0x37   :  { %453 = vperm.xlu1 %1309, %v375_v38   ;;  %v857_v4 = vld [vmem:[%s1928_s5 + $0x60] sm:$0xff]  ;;  %v856_v5 = vld [vmem:[%s1928_s5 + $0x58] sm:$0xff]  ;;  %v859_v6 = vld [vmem:[%s1928_s5 + $0x70] sm:$0xff] }
  0x38   :  { %v858_v7 = vld [vmem:[%s1928_s5 + $0x68] sm:$0xff]  ;;  %v861_v8 = vld [vmem:[%s1928_s5 + $0x80] sm:$0xff]  ;;  %v860_v9 = vld [vmem:[%s1928_s5 + $0x78] sm:$0xff] }
  0x39   :  { %v863_v10 = vld [vmem:[%s1928_s5 + $0x90] sm:$0xff]  ;;  %v862_v11 = vld [vmem:[%s1928_s5 + $0x88] sm:$0xff]  ;;  %v865_v12 = vld [vmem:[%s1928_s5 + $0xa0] sm:$0xff] }
  0x3a   :  { %458 = vperm.xlu0 %1308, %v376_v41   ;;  %v864_v13 = vld [vmem:[%s1928_s5 + $0x98] sm:$0xff]  ;;  %v867_v14 = vld [vmem:[%s1928_s5 + $0xb0] sm:$0xff]  ;;  %v866_v15 = vld [vmem:[%s1928_s5 + $0xa8] sm:$0xff] }
  0x3b   :  { %463 = vperm.xlu1 %1309, %v377_v40   ;;  %v869_v16 = vld [vmem:[%s1928_s5 + $0xc0] sm:$0xff]  ;;  %v868_v17 = vld [vmem:[%s1928_s5 + $0xb8] sm:$0xff]  ;;  %v871_v18 = vld [vmem:[%s1928_s5 + $0xd0] sm:$0xff] }
  0x3c   :  { %v870_v19 = vld [vmem:[%s1928_s5 + $0xc8] sm:$0xff]  ;;  %v1318_v20 = vld [vmem:[%s1926_s3 + $0x30] sm:$0xff]   ;;  %v1319_v21 = vld [vmem:[%s1926_s3] sm:$0xff]  }
  0x3d   :  { %v872_v22 = vld [vmem:[%s1928_s5 + $0xd8] sm:$0xff]  ;;  %v393_v23 = vld [vmem:[%s1927_s4 + $0xe8] sm:$0xff]  ;;  %1269 = vmatprep.mubr.bf16.mxu1 %v1318_v20  ;;  %1257 = vmatprep.mubr.bf16.mxu0 %v1319_v21  ;;  %v873_v24 = vld [vmem:[%s1928_s5 + $0xe0] sm:$0xff] }
  0x3e   :  { %468 = vperm.xlu0 %1308, %v378_v43   ;;  %v394_v25 = vld [vmem:[%s1927_s4 + $0xf0] sm:$0xff]  ;;  %v874_v26 = vld [vmem:[%s1928_s5 + $0xe8] sm:$0xff]  ;;  %v395_v27 = vld [vmem:[%s1927_s4 + $0xf8] sm:$0xff] }
  0x3f   :  { %473 = vperm.xlu1 %1309, %v379_v42   ;;  %v876_v28 = vld [vmem:[%s1928_s5 + $0xf8] sm:$0xff]  ;;  %v875_v29 = vld [vmem:[%s1928_s5 + $0xf0] sm:$0xff]  ;;  %s1357_s5 = smov [#allocation3]  }
  0x40   :  { %s1150_s28 = sshll.u32 %s1357_s5, 4  ;;  %s1151_s28 = int_to_ptr.vmem [resolvable:$true] %s1150_s28 }
  0x41   :  { %s1334_s29 = scalar_lea.vmem %s1151_s28, 16  ;;  %s1338_s30 = scalar_lea.vmem %s1151_s28, 32 }
  0x42   :  { %478 = vperm.xlu0 %1308, %v380_v45   ;;  %p1335_p0 = scmp.ne.s32.totalorder %s1151_s28, %s1334_s29  ;;  %p1339_p1 = scmp.lt.s32.totalorder %s1151_s28, %s1151_s28 }
  0x43   :  { %483 = vperm.xlu1 %1309, %v381_v44   ;;  %p1340_p2 = scmp.lt.s32.totalorder %s1338_s30, %s1334_s29 }
  0x45   :  { %p1341_p3 = por %p1340_p2, %p1339_p1 }
  0x46   :  { %488 = vperm.xlu0 %1308, %v382_v47  }
  0x47   :  { %493 = vperm.xlu1 %1309, %v383_v46   ;;  %p1342_p4 = pnand %p1341_p3, %p1335_p0 }
  0x4a   :  { %498 = vperm.xlu0 %1308, %v384_v49  }
  0x4b   :  { %503 = vperm.xlu1 %1309, %v385_v48  }
  0x4e   :  { %508 = vperm.xlu0 %1308, %v386_v51  }
  0x4f   :  { %513 = vperm.xlu1 %1309, %v387_v50  }
  0x52   :  { %518 = vperm.xlu0 %1308, %v388_v53  }
  0x53   :  { %523 = vperm.xlu1 %1309, %v389_v52  }
  0x56   :  { %528 = vperm.xlu0 %1308, %v390_v55  }
  0x57   :  { %533 = vperm.xlu1 %1309, %v391_v54  }
  0x5a   :  { %538 = vperm.xlu0 %1308, %v392_v57  }
  0x5b   :  { %879 = vperm.xlu1 %1309, %v845_v56  }
  0x5e   :  { %884 = vperm.xlu0 %1308, %v846_v59  }
  0x5f   :  { %889 = vperm.xlu1 %1309, %v847_v58  }
  0x62   :  { %894 = vperm.xlu0 %1308, %v848_v61  }
  0x63   :  { %899 = vperm.xlu1 %1309, %v849_v60  }
  0x66   :  { %904 = vperm.xlu0 %1308, %v850_v63  }
  0x67   :  { %909 = vperm.xlu1 %1309, %v851_v62  }
  0x6a   :  { %914 = vperm.xlu0 %1308, %v852_v1  }
  0x6b   :  { %919 = vperm.xlu1 %1309, %v853_v0  }
  0x6e   :  { %924 = vperm.xlu0 %1308, %v854_v3  }
  0x6f   :  { %929 = vperm.xlu1 %1309, %v855_v2  }
  0x72   :  { %934 = vperm.xlu0 %1308, %v856_v5  }
  0x73   :  { %939 = vperm.xlu1 %1309, %v857_v4  }
  0x76   :  { %944 = vperm.xlu0 %1308, %v858_v7  }
  0x77   :  { %949 = vperm.xlu1 %1309, %v859_v6  }
  0x7a   :  { %954 = vperm.xlu0 %1308, %v860_v9  }
  0x7b   :  { %959 = vperm.xlu1 %1309, %v861_v8  }
  0x7d   :  { %v126_v34 = vpop.permute.xlu1 %125  ;;  %v136_v36 = vpop.permute.xlu0 %135 }
  0x7e   :  { %964 = vperm.xlu0 %1308, %v862_v11  }
  0x7f   :  { %969 = vperm.xlu1 %1309, %v863_v10  }
  0x81   :  { %v141_v41 = vpop.permute.xlu0 %140 }
  0x82   :  { %974 = vperm.xlu0 %1308, %v864_v13   ;;  %v131_v39 = vpop.permute.xlu1 %130 }
  0x83   :  { %979 = vperm.xlu1 %1309, %v865_v12  }
  0x85   :  { %v116_v46 = vpop.permute.xlu0 %115 }
  0x86   :  { %984 = vperm.xlu0 %1308, %v866_v15   ;;  %v121_v44 = vpop.permute.xlu1 %120 }
  0x87   :  { %989 = vperm.xlu1 %1309, %v867_v14  }
  0x89   :  { %v106_v52 = vpop.permute.xlu0 %105 }
  0x8a   :  { %994 = vperm.xlu0 %1308, %v868_v17   ;;  %v111_v49 = vpop.permute.xlu1 %110 }
  0x8b   :  { %999 = vperm.xlu1 %1309, %v869_v16  }
  0x8d   :  { %v96_v2 = vpop.permute.xlu0 %95 }
  0x8e   :  { %1004 = vperm.xlu0 %1308, %v870_v19   ;;  %v101_v61 = vpop.permute.xlu1 %100 }
  0x8f   :  { %1009 = vperm.xlu1 %1309, %v871_v18  }
  0x91   :  { %v86_v12 = vpop.permute.xlu0 %85 }
  0x92   :  { %543 = vperm.xlu0 %1308, %v393_v23   ;;  %v91_v8 = vpop.permute.xlu1 %90 }
  0x93   :  { %1014 = vperm.xlu1 %1309, %v872_v22  }
  0x95   :  { %v76_v21 = vpop.permute.xlu0 %75 }
  0x96   :  { %548 = vperm.xlu0 %1308, %v394_v25   ;;  %v81_v18 = vpop.permute.xlu1 %80 }
  0x97   :  { %1019 = vperm.xlu1 %1309, %v873_v24  }
  0x9a   :  { %553 = vperm.xlu0 %1308, %v395_v27   ;;  %v71_v27 = vpop.permute.xlu1 %70 }
  0x9b   :  { %1024 = vperm.xlu1 %1309, %v874_v26  }
  0x9e   :  { %1029 = vperm.xlu0 %1308, %v875_v29  }
  0x9f   :  { %1034 = vperm.xlu1 %1309, %v876_v28  }
  0xcd   :  { %v1681_v30 = vpop.f32.mrf.mxu0 }
  0xce   :  { %v254_v25 = vadd.f32 %v1681_v30, %v76_v21 }
  0xcf   :  { %v1683_v31 = vpop.f32.mrf.mxu0 }
  0xd1   :  { %v1685_v32 = vpop.f32.mrf.mxu0 }
  0xd2   :  { %v257_v22 = vadd.f32 %v1685_v32, %v81_v18 }
  0xd3   :  { %v1687_v33 = vpop.f32.mrf.mxu0 }
  0xd4   :  { %v311_v28 = vmax.f32 %v257_v22, 0.0  ;;  %v249_v29 = vadd.f32 %v1687_v33, %v71_v27  ;;  %v1320_v33 = vld [vmem:[%s1926_s3 + $0x8] sm:$0xff]  }
  0xd5   :  { %v1231_v35 = vpop.f32.mrf.mxu0 }
  0xd6   :  { %v270_v13 = vadd.f32 %v1231_v35, %v96_v2  ;;  %v66_v35 = vpop.permute.xlu0 %65 }
  0xd7   :  { %v261_v37 = vpop.f32.mrf.mxu0  ;;  %v246_v32 = vadd.f32 %v1683_v31, %v66_v35  ;;  %v1321_v31 = vld [vmem:[%s1926_s3 + $0x38] sm:$0xff]  }
  0xd8   :  { %v314_v19 = vmax.f32 %v270_v13, 0.0  ;;  %v262_v20 = vadd.f32 %v261_v37, %v86_v12 }
  0xd9   :  { %v1232_v38 = vpop.f32.mrf.mxu0  ;;  %v308_v30 = vmax.f32 %v246_v32, 0.0 }
  0xda   :  { %v273_v9 = vadd.f32 %v1232_v38, %v101_v61  ;;  %v312_v26 = vmax.f32 %v262_v20, 0.0  ;;  %v309_v38 = vmax.f32 %v249_v29, 0.0 }
  0xdb   :  { %v264_v40 = vpop.f32.mrf.mxu0 }
  0xdc   :  { %v315_v15 = vmax.f32 %v273_v9, 0.0  ;;  %v265_v16 = vadd.f32 %v264_v40, %v91_v8  ;;  %v1322_v40 = vld [vmem:[%s1926_s3 + $0x10] sm:$0xff]  }
  0xdd   :  { %v1235_v42 = vpop.f32.mrf.mxu0 }
  0xde   :  { %v286_v62 = vadd.f32 %v1235_v42, %v116_v46  ;;  %v359_v23 = vpack.c.bf16 %v315_v15, %v314_v19  ;;  %v313_v24 = vmax.f32 %v265_v16, 0.0  ;;  %v1324_v42 = vld [vmem:[%s1926_s3 + $0x18] sm:$0xff]   ;;  %v1328_v46 = vld [vmem:[%s1926_s3 + $0x28] sm:$0xff]  }
  0xdf   :  { %v277_v43 = vpop.f32.mrf.mxu0 }
  0xe0   :  { %v318_v6 = vmax.f32 %v286_v62, 0.0  ;;  %v278_v7 = vadd.f32 %v277_v43, %v106_v52  ;;  %v1325_v43 = vld [vmem:[%s1926_s3 + $0x48] sm:$0xff]   ;;  %v399_v52 = vpop.permute.xlu0 %398 }
  0xe1   :  { %v1236_v45 = vpop.f32.mrf.mxu0 }
  0xe2   :  { %v289_v57 = vadd.f32 %v1236_v45, %v121_v44  ;;  %v316_v14 = vmax.f32 %v278_v7, 0.0  ;;  %v1326_v44 = vld [vmem:[%s1926_s3 + $0x20] sm:$0xff]   ;;  %v1327_v45 = vld [vmem:[%s1926_s3 + $0x50] sm:$0xff]  }
  0xe3   :  { %v280_v47 = vpop.f32.mrf.mxu0 }
  0xe4   :  { %v319_v3 = vmax.f32 %v289_v57, 0.0  ;;  %v281_v4 = vadd.f32 %v280_v47, %v111_v49  ;;  %v1329_v47 = vld [vmem:[%s1926_s3 + $0x58] sm:$0xff]   ;;  %v1331_v49 = vld [vmem:[%s1926_s3 + $0x68] sm:$0xff]  }
  0xe5   :  { %v1239_v48 = vpop.f32.mrf.mxu0 }
  0xe6   :  { %v302_v51 = vadd.f32 %v1239_v48, %v136_v36  ;;  %v361_v10 = vpack.c.bf16 %v319_v3, %v318_v6  ;;  %v317_v11 = vmax.f32 %v281_v4, 0.0  ;;  %v310_v36 = vmax.f32 %v254_v25, 0.0  ;;  %v1330_v48 = vld [vmem:[%s1926_s3 + $0x60] sm:$0xff]  }
  0xe7   :  { %v293_v50 = vpop.f32.mrf.mxu0 }
  0xe8   :  { %v294_v54 = vadd.f32 %v293_v50, %v126_v34  ;;  %v322_v58 = vmax.f32 %v302_v51, 0.0  ;;  %v360_v17 = vpack.c.bf16 %v317_v11, %v316_v14  ;;  %v358_v34 = vpack.c.bf16 %v313_v24, %v312_v26  ;;  %v1332_v50 = vld [vmem:[%s1926_s3 + $0x70] sm:$0xff]   ;;  %v1333_v51 = vld [vmem:[%s1926_s3 + $0x78] sm:$0xff]  }
  0xe9   :  { %v1240_v53 = vpop.f32.mrf.mxu0  ;;  %v357_v37 = vpack.c.bf16 %v311_v28, %v310_v36 }
  0xea   :  { %v305_v55 = vadd.f32 %v1240_v53, %v141_v41  ;;  %v320_v63 = vmax.f32 %v294_v54, 0.0  ;;  %v1323_v41 = vld [vmem:[%s1926_s3 + $0x40] sm:$0xff]   ;;  %v404_v53 = vpop.permute.xlu1 %403  ;;  %v409_v54 = vpop.permute.xlu0 %408 }
  0xeb   :  { %v296_v56 = vpop.f32.mrf.mxu0 }
  0xec   :  { %v323_v59 = vmax.f32 %v305_v55, 0.0  ;;  %v297_v60 = vadd.f32 %v296_v56, %v131_v39  ;;  %v356_v39 = vpack.c.bf16 %v309_v38, %v308_v30 }
  0xee   :  { %v363_v0 = vpack.c.bf16 %v323_v59, %v322_v58  ;;  %v321_v1 = vmax.f32 %v297_v60, 0.0  ;;  %v414_v55 = vpop.permute.xlu1 %413  ;;  %v419_v56 = vpop.permute.xlu0 %418 }
  0xf0   :  { %v362_v5 = vpack.c.bf16 %v321_v1, %v320_v63  ;;  %1241 = vmatprep.subr.bf16.mxu0 %v363_v0  ;;  %1289 = vmatprep.subr.bf16.mxu1 %v363_v0 }
  0xf1   :  { %1242 = vmatpush3.bf16.msra.mxu0 %v363_v0  ;;  %1297 = vmatpush3.bf16.msra.mxu1 %v363_v0 }
  0xf2   :  { %1243 = vmatprep.subr.bf16.mxu0 %v362_v5  ;;  %1290 = vmatprep.subr.bf16.mxu1 %v362_v5  ;;  %v1735_v57 = vpop.permute.xlu1 %423  ;;  %v429_v58 = vpop.permute.xlu0 %428 }
  0xf5   :  { %1244 = vmatpush3.bf16.msra.mxu0 %v362_v5  ;;  %1298 = vmatpush3.bf16.msra.mxu1 %v362_v5 }
  0xf6   :  { %1245 = vmatprep.subr.bf16.mxu0 %v361_v10  ;;  %1291 = vmatprep.subr.bf16.mxu1 %v361_v10  ;;  %v1737_v59 = vpop.permute.xlu1 %433  ;;  %v1739_v60 = vpop.permute.xlu0 %438 }
  0xf9   :  { %1246 = vmatpush3.bf16.msra.mxu0 %v361_v10  ;;  %1299 = vmatpush3.bf16.msra.mxu1 %v361_v10 }
  0xfa   :  { %1247 = vmatprep.subr.bf16.mxu0 %v360_v17  ;;  %1292 = vmatprep.subr.bf16.mxu1 %v360_v17  ;;  %v1741_v61 = vpop.permute.xlu1 %443  ;;  %v1743_v62 = vpop.permute.xlu0 %448 }
  0xfd   :  { %1248 = vmatpush3.bf16.msra.mxu0 %v360_v17  ;;  %1300 = vmatpush3.bf16.msra.mxu1 %v360_v17 }
  0xfe   :  { %1249 = vmatprep.subr.bf16.mxu0 %v359_v23  ;;  %1293 = vmatprep.subr.bf16.mxu1 %v359_v23  ;;  %v1745_v63 = vpop.permute.xlu1 %453  ;;  %v1747_v0 = vpop.permute.xlu0 %458 }
 0x101   :  { %1250 = vmatpush3.bf16.msra.mxu0 %v359_v23  ;;  %1301 = vmatpush3.bf16.msra.mxu1 %v359_v23 }
 0x102   :  { %1251 = vmatprep.subr.bf16.mxu0 %v358_v34  ;;  %1294 = vmatprep.subr.bf16.mxu1 %v358_v34  ;;  %v1749_v1 = vpop.permute.xlu1 %463  ;;  %v1751_v2 = vpop.permute.xlu0 %468 }
 0x105   :  { %1252 = vmatpush3.bf16.msra.mxu0 %v358_v34  ;;  %1302 = vmatpush3.bf16.msra.mxu1 %v358_v34 }
 0x106   :  { %1253 = vmatprep.subr.bf16.mxu0 %v357_v37  ;;  %1295 = vmatprep.subr.bf16.mxu1 %v357_v37  ;;  %v1753_v3 = vpop.permute.xlu1 %473  ;;  %v1755_v4 = vpop.permute.xlu0 %478 }
 0x109   :  { %1254 = vmatpush3.bf16.msra.mxu0 %v357_v37  ;;  %1303 = vmatpush3.bf16.msra.mxu1 %v357_v37 }
 0x10a   :  { %1255 = vmatprep.subr.bf16.mxu0 %v356_v39  ;;  %1296 = vmatprep.subr.bf16.mxu1 %v356_v39  ;;  %v1757_v5 = vpop.permute.xlu1 %483  ;;  %v1759_v6 = vpop.permute.xlu0 %488 }
 0x10d   :  { %1256 = vmatpush3.bf16.msra.mxu0 %v356_v39  ;;  %1304 = vmatpush3.bf16.msra.mxu1 %v356_v39 }
 0x10e   :  { %v1761_v7 = vpop.permute.xlu1 %493  ;;  %v1763_v8 = vpop.permute.xlu0 %498 }
 0x110   :  { %1258 = vmatmul.mubr.bf16.vlgmr.msra.gmra.mxu0 %v1320_v33  ;;  %1270 = vmatmul.mubr.bf16.vlgmr.msra.gmra.mxu1 %v1321_v31 }
 0x111   :  { %1261 = vmatprep.mubr.bf16.mxu0 %v1322_v40  ;;  %1273 = vmatprep.mubr.bf16.mxu1 %v1323_v41 }
 0x112   :  { %v1765_v9 = vpop.permute.xlu1 %503  ;;  %v1767_v10 = vpop.permute.xlu0 %508 }
 0x116   :  { %v1769_v11 = vpop.permute.xlu1 %513  ;;  %v1771_v12 = vpop.permute.xlu0 %518 }
 0x118   :  { %1262 = vmatmul.mubr.bf16.gmra.mxu0 %v1324_v42  ;;  %1274 = vmatmul.mubr.bf16.gmra.mxu1 %v1325_v43 }
 0x119   :  { %1265 = vmatprep.mubr.bf16.mxu0 %v1326_v44  ;;  %1277 = vmatprep.mubr.bf16.mxu1 %v1327_v45 }
 0x11a   :  { %v1773_v13 = vpop.permute.xlu1 %523  ;;  %v1775_v14 = vpop.permute.xlu0 %528 }
 0x11e   :  { %v1777_v15 = vpop.permute.xlu1 %533  ;;  %v1779_v16 = vpop.permute.xlu0 %538 }
 0x11f   :  { %1931 = vst [vmem:[#allocation6_spill] sm:$0xff] %v1779_v16 }
 0x120   :  { %1266 = vmatmul.mubr.bf16.gmra.mxu0 %v1328_v46  ;;  %1278 = vmatmul.mubr.bf16.gmra.mxu1 %v1329_v47 }
 0x121   :  { %1281 = vmatprep.mubr.bf16.mxu1 %v1330_v48 }
 0x122   :  { %v880_v17 = vpop.permute.xlu1 %879  ;;  %v885_v18 = vpop.permute.xlu0 %884 }
 0x126   :  { %v890_v19 = vpop.permute.xlu1 %889  ;;  %v895_v20 = vpop.permute.xlu0 %894 }
 0x128   :  { %1282 = vmatmul.mubr.bf16.gmra.mxu1 %v1331_v49 }
 0x129   :  { %1285 = vmatprep.mubr.bf16.mxu1 %v1332_v50 }
 0x12a   :  { %v900_v21 = vpop.permute.xlu1 %899  ;;  %v1781_v22 = vpop.permute.xlu0 %904 }
 0x12e   :  { %v910_v23 = vpop.permute.xlu1 %909  ;;  %v1783_v24 = vpop.permute.xlu0 %914 }
 0x130   :  { %1286 = vmatmul.mubr.bf16.gmra.mxu1 %v1333_v51 }
 0x132   :  { %v1785_v25 = vpop.permute.xlu1 %919  ;;  %v1787_v26 = vpop.permute.xlu0 %924 }
 0x136   :  { %v1789_v27 = vpop.permute.xlu1 %929  ;;  %v1793_v34 = vpop.permute.xlu0 %934 }
 0x13a   :  { %v1797_v32 = vpop.permute.xlu1 %939  ;;  %v1803_v42 = vpop.permute.xlu0 %944 }
 0x13e   :  { %v1807_v47 = vpop.permute.xlu1 %949 }
 0x1d0   :  { %v1259_v28 = vpop.f32.mrf.mxu0  ;;  %v1791_v29 = vpop.f32.mrf.mxu1 }
 0x1d1   :  { %v695_v38 = vadd.f32 %v1259_v28, %v409_v54 }
 0x1d2   :  { %v686_v35 = vpop.f32.mrf.mxu0  ;;  %v1795_v36 = vpop.f32.mrf.mxu1 }
 0x1d3   :  { %v687_v37 = vadd.f32 %v686_v35, %v399_v52  ;;  %v815_v43 = vmax.f32 %v695_v38, 0.0  ;;  %v1813_v38 = vpop.permute.xlu0 %954 }
 0x1d4   :  { %v1260_v30 = vpop.f32.mrf.mxu0  ;;  %v1799_v39 = vpop.f32.mrf.mxu1 }
 0x1d5   :  { %v813_v33 = vmax.f32 %v687_v37, 0.0  ;;  %v698_v31 = vadd.f32 %v1260_v30, %v414_v55  ;;  %v1039_v55 = vmul.f32 %v890_v19, %v815_v43 }
 0x1d6   :  { %v689_v40 = vpop.f32.mrf.mxu0  ;;  %v1801_v41 = vpop.f32.mrf.mxu1 }
 0x1d7   :  { %v690_v44 = vadd.f32 %v689_v40, %v404_v53  ;;  %v1037_v48 = vmul.f32 %v880_v17, %v813_v33  ;;  %v816_v49 = vmax.f32 %v698_v31, 0.0 }
 0x1d8   :  { %v1263_v45 = vpop.f32.mrf.mxu0  ;;  %v1805_v46 = vpop.f32.mrf.mxu1 }
 0x1d9   :  { %v814_v50 = vmax.f32 %v690_v44, 0.0  ;;  %v711_v35 = vadd.f32 %v1263_v45, %v429_v58  ;;  %v1070_v40 = vsel %vm1069_vm1, %v1037_v48, 0.0  ;;  %v1040_v16 = vmul.f32 %v895_v20, %v816_v49 }
 0x1da   :  { %v702_v51 = vpop.f32.mrf.mxu0  ;;  %v1809_v52 = vpop.f32.mrf.mxu1 }
 0x1db   :  { %v703_v54 = vadd.f32 %v702_v51, %v419_v56  ;;  %v1038_v28 = vmul.f32 %v885_v18, %v814_v50  ;;  %v1820_v56 = vpop.permute.xlu1 %959  ;;  %v1073_v18 = vsel %vm1069_vm1, %v1039_v55, 0.0  ;;  %v819_v19 = vmax.f32 %v711_v35, 0.0 }
 0x1dc   :  { %v1264_v37 = vpop.f32.mrf.mxu0  ;;  %v1811_v30 = vpop.f32.mrf.mxu1  ;;  %v1075_v48 = vsel %vm1069_vm1, %v1040_v16, 0.0 }
 0x1dd   :  { %v817_v53 = vmax.f32 %v703_v54, 0.0  ;;  %v1071_v17 = vsel %vm1069_vm1, %v1038_v28, 0.0  ;;  %v714_v33 = vadd.f32 %v1264_v37, %v1737_v59  ;;  %v1829_v37 = vpop.permute.xlu0 %964 }
 0x1de   :  { %v705_v31 = vpop.f32.mrf.mxu0  ;;  %v1818_v44 = vpop.f32.mrf.mxu1  ;;  %v1072_v58 = vadd.f32 %v1071_v17, %v1070_v40  ;;  %v1043_v17 = vmul.f32 %v910_v23, %v819_v19 }
 0x1df   :  { %v1041_v43 = vmul.f32 %v900_v21, %v817_v53  ;;  %v706_v45 = vadd.f32 %v705_v31, %v1735_v57  ;;  %v820_v49 = vmax.f32 %v714_v33, 0.0  ;;  %v1837_v33 = vpop.permute.xlu1 %969 }
 0x1e0   :  { %v1267_v50 = vpop.f32.mrf.mxu0  ;;  %v1824_v51 = vpop.f32.mrf.mxu1  ;;  %v1074_v20 = vadd.f32 %v1073_v18, %v1072_v58 }
 0x1e1   :  { %v818_v59 = vmax.f32 %v706_v45, 0.0  ;;  %v1077_v55 = vsel %vm1069_vm1, %v1041_v43, 0.0  ;;  %v727_v16 = vadd.f32 %v1267_v50, %v1743_v62  ;;  %v1044_v58 = vmul.f32 %v1783_v24, %v820_v49  ;;  %v1847_v24 = vpop.permute.xlu0 %974 }
 0x1e2   :  { %v718_v54 = vpop.f32.mrf.mxu0  ;;  %v1827_v28 = vpop.f32.mrf.mxu1  ;;  %v1076_v40 = vadd.f32 %v1075_v48, %v1074_v20  ;;  %v735_v48 = vadd.f32 %v1795_v36, %v1747_v0 }
 0x1e3   :  { %v1042_v21 = vmul.f32 %v1781_v22, %v818_v59  ;;  %v719_v57 = vadd.f32 %v718_v54, %v1739_v60  ;;  %v1081_v22 = vsel %vm1069_vm1, %v1043_v17, 0.0  ;;  %v823_v50 = vmax.f32 %v727_v16, 0.0 }
 0x1e4   :  { %v1268_v35 = vpop.f32.mrf.mxu0  ;;  %v1834_v53 = vpop.f32.mrf.mxu1  ;;  %v1078_v31 = vadd.f32 %v1077_v55, %v1076_v40  ;;  %v1083_v49 = vsel %vm1069_vm1, %v1044_v58, 0.0  ;;  %v738_v54 = vadd.f32 %v1801_v41, %v1749_v1  ;;  %v746_v1 = vadd.f32 %v1799_v39, %v1753_v3 }
 0x1e5   :  { %v1079_v18 = vsel %vm1069_vm1, %v1042_v21, 0.0  ;;  %v821_v45 = vmax.f32 %v719_v57, 0.0  ;;  %v730_v43 = vadd.f32 %v1268_v35, %v1745_v63  ;;  %v1852_v55 = vpop.permute.xlu1 %979  ;;  %v1047_v21 = vmul.f32 %v1789_v27, %v823_v50  ;;  %v985_v58 = vpop.permute.xlu0 %984 }
 0x1e6   :  { %v721_v23 = vpop.f32.mrf.mxu0  ;;  %v1080_v19 = vadd.f32 %v1079_v18, %v1078_v31  ;;  %v769_v20 = vpop.f32.mrf.mxu1  ;;  %v826_v41 = vmax.f32 %v738_v54, 0.0  ;;  %v751_v27 = vadd.f32 %v1809_v52, %v1755_v4  ;;  %v759_v4 = vadd.f32 %v1805_v46, %v1759_v6 }
 0x1e7   :  { %v1045_v60 = vmul.f32 %v1785_v25, %v821_v45  ;;  %v722_v59 = vadd.f32 %v721_v23, %v1741_v61  ;;  %v824_v40 = vmax.f32 %v730_v43, 0.0  ;;  %v743_v25 = vadd.f32 %v1791_v29, %v1751_v2 }
 0x1e8   :  { %v1082_v62 = vadd.f32 %v1081_v22, %v1080_v19  ;;  %v1857_v36 = vpop.f32.mrf.mxu1  ;;  %v825_v61 = vmax.f32 %v735_v48, 0.0  ;;  %v1089_v23 = vsel %vm1069_vm1, %v1047_v21, 0.0  ;;  %v828_v43 = vmax.f32 %v746_v1, 0.0 }
 0x1e9   :  { %v822_v17 = vmax.f32 %v722_v59, 0.0  ;;  %v1085_v0 = vsel %vm1069_vm1, %v1045_v60, 0.0  ;;  %v1048_v31 = vmul.f32 %v1793_v34, %v824_v40  ;;  %v827_v18 = vmax.f32 %v743_v25, 0.0 }
 0x1ea   :  { %v1084_v63 = vadd.f32 %v1083_v49, %v1082_v62  ;;  %v782_v29 = vpop.f32.mrf.mxu1  ;;  %v1049_v45 = vmul.f32 %v1797_v32, %v825_v61  ;;  %v1050_v3 = vmul.f32 %v1803_v42, %v826_v41  ;;  %v754_v34 = vadd.f32 %v1818_v44, %v1757_v5  ;;  %v995_v62 = vpop.permute.xlu0 %994 }
 0x1eb   :  { %v1046_v35 = vmul.f32 %v1787_v26, %v822_v17  ;;  %v990_v26 = vpop.permute.xlu1 %989  ;;  %v1091_v39 = vsel %vm1069_vm1, %v1048_v31, 0.0  ;;  %v1051_v48 = vmul.f32 %v1807_v47, %v827_v18  ;;  %v829_v52 = vmax.f32 %v751_v27, 0.0 }
 0x1ec   :  { %v1086_v57 = vadd.f32 %v1085_v0, %v1084_v63  ;;  %v1284_v60 = vpop.f32.mrf.mxu1  ;;  %v1093_v32 = vsel %vm1069_vm1, %v1049_v45, 0.0  ;;  %v1052_v59 = vmul.f32 %v1813_v38, %v828_v43  ;;  %v1095_v42 = vsel %vm1069_vm1, %v1050_v3, 0.0 }
 0x1ed   :  { %v1087_v16 = vsel %vm1069_vm1, %v1046_v35, 0.0  ;;  %v762_v5 = vadd.f32 %v1811_v30, %v1761_v7  ;;  %v830_v44 = vmax.f32 %v754_v34, 0.0  ;;  %v1097_v47 = vsel %vm1069_vm1, %v1051_v48, 0.0 }
 0x1ee   :  { %v1088_v2 = vadd.f32 %v1087_v16, %v1086_v57  ;;  %v785_v63 = vpop.f32.mrf.mxu1  ;;  %v831_v40 = vmax.f32 %v759_v4, 0.0  ;;  %v1053_v17 = vmul.f32 %v1820_v56, %v829_v52  ;;  %v767_v6 = vadd.f32 %v1827_v28, %v1763_v8  ;;  %v1005_v30 = vpop.permute.xlu0 %1004 }
 0x1ef   :  { %v1000_v49 = vpop.permute.xlu1 %999  ;;  %v1099_v38 = vsel %vm1069_vm1, %v1052_v59, 0.0  ;;  %v832_v25 = vmax.f32 %v762_v5, 0.0  ;;  %v1054_v0 = vmul.f32 %v1829_v37, %v830_v44  ;;  %v770_v7 = vadd.f32 %v769_v20, %v1765_v9  ;;  %v1932_v59 = vld [vmem:[#allocation6_spill] sm:$0xff] }
 0x1f0   :  { %v1090_v19 = vadd.f32 %v1089_v23, %v1088_v2  ;;  %v1287_v21 = vpop.f32.mrf.mxu1  ;;  %v1055_v57 = vmul.f32 %v1837_v33, %v831_v40  ;;  %v1101_v35 = vsel %vm1069_vm1, %v1053_v17, 0.0  ;;  %v775_v56 = vadd.f32 %v1824_v51, %v1767_v10 }
 0x1f1   :  { %v833_v1 = vmax.f32 %v767_v6, 0.0  ;;  %v1056_v41 = vmul.f32 %v1847_v24, %v832_v25  ;;  %v1103_v31 = vsel %vm1069_vm1, %v1054_v0, 0.0  ;;  %v778_v9 = vadd.f32 %v1834_v53, %v1769_v11 }
 0x1f2   :  { %v1092_v22 = vadd.f32 %v1091_v39, %v1090_v19  ;;  %v834_v37 = vmax.f32 %v770_v7, 0.0  ;;  %v798_v16 = vpop.f32.mrf.mxu1  ;;  %v1105_v33 = vsel %vm1069_vm1, %v1055_v57, 0.0  ;;  %v835_v2 = vmax.f32 %v775_v56, 0.0  ;;  %v544_v51 = vpop.permute.xlu0 %543 }
 0x1f3   :  { %v1010_v8 = vpop.permute.xlu1 %1009  ;;  %v1057_v18 = vmul.f32 %v1852_v55, %v833_v1  ;;  %v783_v10 = vadd.f32 %v782_v29, %v1771_v12  ;;  %v1107_v27 = vsel %vm1069_vm1, %v1056_v41, 0.0  ;;  %v836_v24 = vmax.f32 %v778_v9, 0.0 }
 0x1f4   :  { %v1094_v50 = vadd.f32 %v1093_v32, %v1092_v22  ;;  %v1058_v23 = vmul.f32 %v985_v58, %v834_v37  ;;  %v786_v19 = vadd.f32 %v785_v63, %v1773_v13  ;;  %v1288_v53 = vpop.f32.mrf.mxu1  ;;  %v1059_v3 = vmul.f32 %v990_v26, %v835_v2 }
 0x1f5   :  { %v1109_v34 = vsel %vm1069_vm1, %v1057_v18, 0.0  ;;  %v791_v39 = vadd.f32 %v1857_v36, %v1775_v14  ;;  %v837_v55 = vmax.f32 %v783_v10, 0.0  ;;  %v1060_v12 = vmul.f32 %v995_v62, %v836_v24 }
 0x1f6   :  { %v1096_v54 = vadd.f32 %v1095_v42, %v1094_v50  ;;  %v1111_v29 = vsel %vm1069_vm1, %v1058_v23, 0.0  ;;  %v794_v48 = vadd.f32 %v1284_v60, %v1777_v15  ;;  %v838_v32 = vmax.f32 %v786_v19, 0.0  ;;  %v549_v58 = vpop.permute.xlu0 %548  ;;  %v801_v13 = vpop.f32.mrf.mxu1 }
 0x1f7   :  { %v1015_v43 = vpop.permute.xlu1 %1014  ;;  %v1113_v52 = vsel %vm1069_vm1, %v1059_v3, 0.0  ;;  %v839_v50 = vmax.f32 %v791_v39, 0.0  ;;  %v1061_v26 = vmul.f32 %v1000_v49, %v837_v55  ;;  %v799_v42 = vadd.f32 %v798_v16, %v1932_v59 }
 0x1f8   :  { %v1098_v46 = vadd.f32 %v1097_v47, %v1096_v54  ;;  %v1115_v14 = vsel %vm1069_vm1, %v1060_v12, 0.0  ;;  %v840_v36 = vmax.f32 %v794_v48, 0.0  ;;  %v1062_v62 = vmul.f32 %v1005_v30, %v838_v32 }
 0x1f9   :  { %v802_v54 = vadd.f32 %v801_v13, %v544_v51  ;;  %v1063_v47 = vmul.f32 %v1010_v8, %v839_v50  ;;  %v1117_v15 = vsel %vm1069_vm1, %v1061_v26, 0.0  ;;  %v807_v60 = vadd.f32 %v1287_v21, %v549_v58 }
 0x1fa   :  { %v1100_v61 = vadd.f32 %v1099_v38, %v1098_v46  ;;  %v841_v40 = vmax.f32 %v799_v42, 0.0  ;;  %v554_v17 = vpop.permute.xlu0 %553  ;;  %v1064_v46 = vmul.f32 %v1015_v43, %v840_v36  ;;  %v1119_v49 = vsel %vm1069_vm1, %v1062_v62, 0.0 }
 0x1fb   :  { %v1020_v5 = vpop.permute.xlu1 %1019  ;;  %v810_v38 = vadd.f32 %v1288_v53, %v554_v17  ;;  %v842_v25 = vmax.f32 %v802_v54, 0.0  ;;  %v843_v57 = vmax.f32 %v807_v60, 0.0  ;;  %v1140_v43 = vstv %s1929_s6 }
 0x1fc   :  { %v1102_v28 = vadd.f32 %v1101_v35, %v1100_v61  ;;  %v1121_v61 = vsel %vm1069_vm1, %v1063_v47, 0.0  ;;  %v1065_v30 = vmul.f32 %v1020_v5, %v841_v40  ;;  %v1123_v56 = vsel %vm1069_vm1, %v1064_v46, 0.0 }
 0x1fd   :  { %v844_v1 = vmax.f32 %v810_v38, 0.0 }
 0x1fe   :  { %v1104_v20 = vadd.f32 %v1103_v31, %v1102_v28  ;;  %v1030_v21 = vpop.permute.xlu0 %1029  ;;  %v1125_v31 = vsel %vm1069_vm1, %v1065_v30, 0.0 }
 0x1ff   :  { %v1025_v0 = vpop.permute.xlu1 %1024  ;;  %v1067_v41 = vmul.f32 %v1030_v21, %v843_v57 }
 0x200   :  { %v1106_v45 = vadd.f32 %v1105_v33, %v1104_v20  ;;  %v1066_v8 = vmul.f32 %v1025_v0, %v842_v25 }
 0x201   :  { %v1129_v2 = vsel %vm1069_vm1, %v1067_v41, 0.0 }
 0x202   :  { %v1108_v11 = vadd.f32 %v1107_v27, %v1106_v45  ;;  %v1127_v16 = vsel %vm1069_vm1, %v1066_v8, 0.0 }
 0x203   :  { %v1035_v9 = vpop.permute.xlu1 %1034 }
 0x204   :  { %v1110_v22 = vadd.f32 %v1109_v34, %v1108_v11  ;;  %v1068_v20 = vmul.f32 %v1035_v9, %v844_v1 }
 0x206   :  { %v1112_v4 = vadd.f32 %v1111_v29, %v1110_v22  ;;  %v1131_v10 = vsel %vm1069_vm1, %v1068_v20, 0.0 }
 0x208   :  { %v1114_v44 = vadd.f32 %v1113_v52, %v1112_v4 }
 0x20a   :  { %v1116_v63 = vadd.f32 %v1115_v14, %v1114_v44 }
 0x20c   :  { %v1118_v6 = vadd.f32 %v1117_v15, %v1116_v63 }
 0x20e   :  { %v1120_v7 = vadd.f32 %v1119_v49, %v1118_v6 }
 0x210   :  { %v1122_v35 = vadd.f32 %v1121_v61, %v1120_v7 }
 0x212   :  { %v1124_v28 = vadd.f32 %v1123_v56, %v1122_v35 }
 0x214   :  { %v1126_v37 = vadd.f32 %v1125_v31, %v1124_v28 }
 0x216   :  { %v1128_v33 = vadd.f32 %v1127_v16, %v1126_v37 }
 0x218   :  { %v1130_v18 = vadd.f32 %v1129_v2, %v1128_v33 }
 0x21a   :  { %v1132_v51 = vadd.f32 %v1131_v10, %v1130_v18 }
 0x21c   :  { %v1133_v45 = vrot.slane %v1132_v51, 4 }
 0x21e   :  { %v1134_v27 = vadd.f32 %v1133_v45, %v1132_v51 }
 0x220   :  { %v1135_v24 = vrot.slane %v1134_v27, 2 }
 0x222   :  { %v1136_v23 = vadd.f32 %v1135_v24, %v1134_v27 }
 0x224   :  { %v1137_v19 = vrot.slane %v1136_v23, 1 }
 0x226   :  { %v1138_v11 = vadd.f32 %v1137_v19, %v1136_v23 }
 0x228   :  { %v1141_v53 = vadd.f32 %v1140_v43, %v1138_v11 }
 0x22a   :  { %1143 = vst.msk [vmem:[#allocation3] sm:$0x1] %vm1142_vm2, %v1141_v53 }
 0x22b   :  { %1345 = shalt.err (!%p1342_p4)
}
 0x22c   :  { %1153 = dma.vmem_to_hbm [thread:$0]  %s1151_s28, 16, %s1930_s7, [#allocation4]  }
 0x22d   :  { %1354 = dma.done.wait [#allocation4], 16  }
 0x22e   :  { %1355 = vsyncadd [#allocation4], 4294967280 }
 0x22f   :  { %1157 = vsyncpa [#allocation4], 1 }

</bundles_post_ra>
